<compile_context>
chip_gen: v7x
topology: tpu7x:2x2x1
jax: 0.10.0
libtpu: 0.0.40
codegen_flags: <defaults>
</compile_context>

<pallas_src>
import functools

import jax
import jax.numpy as jnp
from jax.experimental import pallas as pl
from jax.experimental.pallas import tpu as pltpu


def _fused_kernel(x_ref, w_ref, s_ref, g_ref, b_ref,
                  o_ref, mean_ref, var_ref, *, mxu_dtype):
    # x254 = x253 * x248 folded into the small weight: (scale*x) conv W == (W*scale) @ x
    w = (w_ref[...] * s_ref[...]).astype(mxu_dtype)          # (bc, Cin), tiny
    x = x_ref[...].astype(mxu_dtype)                          # (Cin, M), cast in VMEM
    # x255 = 1x1 conv (no bias) == channel-major matmul on the MXU, f32 accumulator.
    y = jnp.dot(w, x, preferred_element_type=jnp.float32)     # (bc, M) f32
    # x256 = BatchNorm2d (training): per-output-channel batch stats, two-pass variance.
    inv_m = 1.0 / y.shape[1]
    mean = jnp.sum(y, axis=1, keepdims=True) * inv_m          # (bc, 1)
    d = y - mean
    var = jnp.sum(d * d, axis=1, keepdims=True) * inv_m       # biased variance
    a = g_ref[...] * jax.lax.rsqrt(var + 1e-3)                # eps = 0.001
    o_ref[...] = (d * a + b_ref[...]).astype(o_ref.dtype)
    mean_ref[...] = mean
    var_ref[...] = var


def fused_mul_conv1x1_bn(x248, x253, w, gamma, beta, *, mxu_dtype=jnp.bfloat16):
    """x248: (N, Cin, H, W), x253: (N, Cin, 1, 1), w: (Cout, Cin, 1, 1).

    Returns (y_nchw, batch_mean, batch_var_biased).  Running-buffer update is
    the caller's:  rm' = (1-m)*rm + m*mean ;  rv' = (1-m)*rv + m*var*M/(M-1).
    """
    N, Cin, H, W = x248.shape
    Cout = w.shape[0]
    # TODO(synk): for N > 1 add a batch grid dimension ((N,Cin,HW)->(Cin,N*HW) is not a
    # free reshape); for very large M, tile M with sum/sumsq accumulators for the BN.
    assert N == 1, "channel-major free-reshape path assumes N == 1"
    M = H * W

    # Split Cout into blocks; with dimension_semantics=("parallel",) the blocks are
    # sharded across TensorCores on v7x.  BN stats are per-output-channel, so no
    # cross-block reduction is needed.
    n_blk = 2 if (Cout % 2 == 0 and (Cout // 2) % 8 == 0) else 1
    bc = Cout // n_blk

    # Layout-free reshapes (no transposes, no HBM round trips).
    x_cm = x248.reshape(Cin, M)
    w2d = w.reshape(Cout, Cin)
    s2d = x253.reshape(1, Cin)
    g2d = gamma.reshape(Cout, 1)
    b2d = beta.reshape(Cout, 1)

    cost = pl.CostEstimate(
        flops=2 * M * Cin * Cout + 7 * M * Cout + Cout * Cin,
        transcendentals=Cout,
        bytes_accessed=4 * (M * Cin + Cout * Cin + Cin + 2 * Cout
                            + Cout * M + 2 * Cout),
    )

    out_cm, mean, var = pl.pallas_call(
        functools.partial(_fused_kernel, mxu_dtype=mxu_dtype),
        grid=(n_blk,),
        out_shape=(
            jax.ShapeDtypeStruct((Cout, M), jnp.float32),
            jax.ShapeDtypeStruct((Cout, 1), jnp.float32),
            jax.ShapeDtypeStruct((Cout, 1), jnp.float32),
        ),
        in_specs=[
            pl.BlockSpec((Cin, M), lambda i: (0, 0)),   # constant block -> single x fetch
            pl.BlockSpec((bc, Cin), lambda i: (i, 0)),
            pl.BlockSpec((1, Cin), lambda i: (0, 0)),
            pl.BlockSpec((bc, 1), lambda i: (i, 0)),
            pl.BlockSpec((bc, 1), lambda i: (i, 0)),
        ],
        out_specs=(
            pl.BlockSpec((bc, M), lambda i: (i, 0)),
            pl.BlockSpec((bc, 1), lambda i: (i, 0)),
            pl.BlockSpec((bc, 1), lambda i: (i, 0)),
        ),
        compiler_params=pltpu.CompilerParams(
            dimension_semantics=("parallel",)),
        cost_estimate=cost,
        # Footprint ~2.5 MiB incl. double-buffering; default scoped VMEM limit is plenty.
    )(x_cm, w2d, s2d, g2d, b2d)

    # TODO(synk): fuse the producer of x248 and the consumer of x256 into this same
    # pallas_call (or batch several 1x1-conv+BN branches) — the ~1-3 us body is
    # comparable to per-call overhead, which is the dominant remaining cost.
    return out_cm.reshape(N, Cout, H, W), mean.reshape(Cout), var.reshape(Cout)


def _reference(x248, x253, w, gamma, beta):
    x = x253 * x248
    y = jax.lax.conv_general_dilated(
        x, w, window_strides=(1, 1), padding="VALID",
        dimension_numbers=("NCHW", "OIHW", "NCHW"))
    mean = jnp.mean(y, axis=(0, 2, 3), keepdims=True)
    var = jnp.mean((y - mean) ** 2, axis=(0, 2, 3), keepdims=True)
    out = (y - mean) * jax.lax.rsqrt(var + 1e-3) * gamma.reshape(1, -1, 1, 1) \
        + beta.reshape(1, -1, 1, 1)
    return out, mean.reshape(-1), var.reshape(-1)


if __name__ == "__main__":
    key = jax.random.PRNGKey(0)
    k1, k2, k3, k4, k5 = jax.random.split(key, 5)

    # Shapes from the module spec: x248 (1,768,14,14), x253 (1,768,1,1), Conv 768->128.
    N, Cin, H, W, Cout = 1, 768, 14, 14, 128
    x248 = jax.random.normal(k1, (N, Cin, H, W), dtype=jnp.float32)
    x253 = jax.random.normal(k2, (N, Cin, 1, 1), dtype=jnp.float32)
    w = jax.random.normal(k3, (Cout, Cin, 1, 1), dtype=jnp.float32) * 0.02
    gamma = 1.0 + 0.1 * jax.random.normal(k4, (Cout,), dtype=jnp.float32)
    beta = 0.1 * jax.random.normal(k5, (Cout,), dtype=jnp.float32)

    out, bmean, bvar = fused_mul_conv1x1_bn(x248, x253, w, gamma, beta)
    out = jax.block_until_ready(out)

    ref_out, ref_mean, ref_var = _reference(x248, x253, w, gamma, beta)
    ref_out = jax.block_until_ready(ref_out)

    assert out.shape == (N, Cout, H, W)
    # bf16 MXU operands with f32 accumulation -> ~1e-3-level relative error vs pure f32.
    assert jnp.allclose(out, ref_out, atol=2e-2, rtol=2e-2)
    assert jnp.allclose(bmean, ref_mean, atol=5e-3, rtol=2e-2)
    assert jnp.allclose(bvar, ref_var, atol=2e-2, rtol=2e-2)
    print("KERNEL_OK")
</pallas_src>

<mosaic_0001>
module attributes {stable_mosaic.version = 11 : i64} {
  func.func @_fused_kernel(%arg0: i32, %arg1: memref<768x196xf32, #tpu.memory_space<vmem>>, %arg2: memref<64x768xf32, #tpu.memory_space<vmem>>, %arg3: memref<1x768xf32, #tpu.memory_space<vmem>>, %arg4: memref<64x1xf32, #tpu.memory_space<vmem>>, %arg5: memref<64x1xf32, #tpu.memory_space<vmem>>, %arg6: memref<64x196xf32, #tpu.memory_space<vmem>>, %arg7: memref<64x1xf32, #tpu.memory_space<vmem>>, %arg8: memref<64x1xf32, #tpu.memory_space<vmem>>) attributes {dimension_semantics = [#tpu.dimension_semantics<parallel>], iteration_bounds = array<i64: 2>, scalar_prefetch = 0 : i64, scratch_operands = 0 : i64, tpu.core_type = #tpu.core_type<tc>, window_params = [{pipeline_mode = #tpu.pipeline_mode<synchronous>, transform_indices = @transform_0, window_bounds = array<i64: 768, 196>}, {transform_indices = @transform_1, window_bounds = array<i64: 64, 768>}, {pipeline_mode = #tpu.pipeline_mode<synchronous>, transform_indices = @transform_2, window_bounds = array<i64: 1, 768>}, {transform_indices = @transform_3, window_bounds = array<i64: 64, 1>}, {transform_indices = @transform_4, window_bounds = array<i64: 64, 1>}, {transform_indices = @transform_5, window_bounds = array<i64: 64, 196>}, {transform_indices = @transform_6, window_bounds = array<i64: 64, 1>}, {transform_indices = @transform_7, window_bounds = array<i64: 64, 1>}]} {
    %c0 = arith.constant 0 : index
    %c0_0 = arith.constant 0 : index
    %0 = vector.load %arg2[%c0, %c0_0] : memref<64x768xf32, #tpu.memory_space<vmem>>, vector<64x768xf32>
    %c0_1 = arith.constant 0 : index
    %c0_2 = arith.constant 0 : index
    %1 = vector.load %arg3[%c0_1, %c0_2] : memref<1x768xf32, #tpu.memory_space<vmem>>, vector<1x768xf32>
    %2 = vector.broadcast %1 : vector<1x768xf32> to vector<64x768xf32>
    %3 = arith.mulf %0, %2 : vector<64x768xf32>
    %4 = arith.truncf %3 : vector<64x768xf32> to vector<64x768xbf16>
    %c0_3 = arith.constant 0 : index
    %c0_4 = arith.constant 0 : index
    %5 = vector.load %arg1[%c0_3, %c0_4] : memref<768x196xf32, #tpu.memory_space<vmem>>, vector<768x196xf32>
    %6 = arith.truncf %5 : vector<768x196xf32> to vector<768x196xbf16>
    %cst = arith.constant dense<0.000000e+00> : vector<64x196xf32>
    %7 = tpu.matmul %4, %6, %cst {dimension_numbers = #tpu.dot_dimension_numbers<[1], [0], [0], [1], [0, 0, 1, 1], [], []>} : vector<64x768xbf16>, vector<768x196xbf16>, vector<64x196xf32> -> vector<64x196xf32>
    %cst_5 = arith.constant dense<0.000000e+00> : vector<64xf32>
    %8 = vector.multi_reduction <add>, %7, %cst_5 [1] : vector<64x196xf32> to vector<64xf32>
    %9 = vector.shape_cast %8 : vector<64xf32> to vector<64x1xf32>
    %cst_6 = arith.constant 0.00510204071 : f32
    %10 = vector.broadcast %cst_6 : f32 to vector<64x1xf32>
    %11 = arith.mulf %9, %10 : vector<64x1xf32>
    %12 = vector.broadcast %11 : vector<64x1xf32> to vector<64x196xf32>
    %13 = arith.subf %7, %12 : vector<64x196xf32>
    %14 = arith.mulf %13, %13 : vector<64x196xf32>
    %cst_7 = arith.constant dense<0.000000e+00> : vector<64xf32>
    %15 = vector.multi_reduction <add>, %14, %cst_7 [1] : vector<64x196xf32> to vector<64xf32>
    %16 = vector.shape_cast %15 : vector<64xf32> to vector<64x1xf32>
    %cst_8 = arith.constant 0.00510204071 : f32
    %17 = vector.broadcast %cst_8 : f32 to vector<64x1xf32>
    %18 = arith.mulf %16, %17 : vector<64x1xf32>
    %c0_9 = arith.constant 0 : index
    %c0_10 = arith.constant 0 : index
    %19 = vector.load %arg4[%c0_9, %c0_10] : memref<64x1xf32, #tpu.memory_space<vmem>>, vector<64x1xf32>
    %cst_11 = arith.constant 1.000000e-03 : f32
    %20 = vector.broadcast %cst_11 : f32 to vector<64x1xf32>
    %21 = arith.addf %18, %20 : vector<64x1xf32>
    %22 = math.rsqrt %21 : vector<64x1xf32>
    %23 = arith.mulf %19, %22 : vector<64x1xf32>
    %24 = vector.broadcast %23 : vector<64x1xf32> to vector<64x196xf32>
    %25 = arith.mulf %13, %24 : vector<64x196xf32>
    %c0_12 = arith.constant 0 : index
    %c0_13 = arith.constant 0 : index
    %26 = vector.load %arg5[%c0_12, %c0_13] : memref<64x1xf32, #tpu.memory_space<vmem>>, vector<64x1xf32>
    %27 = vector.broadcast %26 : vector<64x1xf32> to vector<64x196xf32>
    %28 = arith.addf %25, %27 : vector<64x196xf32>
    %c0_14 = arith.constant 0 : index
    %c0_15 = arith.constant 0 : index
    %29 = vector.load %arg6[%c0_14, %c0_15] : memref<64x196xf32, #tpu.memory_space<vmem>>, vector<64x196xf32>
    tpu.vector_store %arg6[%c0_14, %c0_15], %28 {strides = array<i32>} : memref<64x196xf32, #tpu.memory_space<vmem>>, vector<64x196xf32>,
    %c0_16 = arith.constant 0 : index
    %c0_17 = arith.constant 0 : index
    %30 = vector.load %arg7[%c0_16, %c0_17] : memref<64x1xf32, #tpu.memory_space<vmem>>, vector<64x1xf32>
    tpu.vector_store %arg7[%c0_16, %c0_17], %11 {strides = array<i32>} : memref<64x1xf32, #tpu.memory_space<vmem>>, vector<64x1xf32>,
    %c0_18 = arith.constant 0 : index
    %c0_19 = arith.constant 0 : index
    %31 = vector.load %arg8[%c0_18, %c0_19] : memref<64x1xf32, #tpu.memory_space<vmem>>, vector<64x1xf32>
    tpu.vector_store %arg8[%c0_18, %c0_19], %18 {strides = array<i32>} : memref<64x1xf32, #tpu.memory_space<vmem>>, vector<64x1xf32>,
    return
  }
  func.func @transform_0(%arg0: i32) -> (i32, i32) {
    %c0_i32 = arith.constant 0 : i32
    %c0_i32_0 = arith.constant 0 : i32
    %c0_i32_1 = arith.constant 0 : i32
    return %c0_i32, %c0_i32_0 : i32, i32
  }
  func.func @transform_1(%arg0: i32) -> (i32, i32) {
    %c0_i32 = arith.constant 0 : i32
    %c0_i32_0 = arith.constant 0 : i32
    return %arg0, %c0_i32 : i32, i32
  }
  func.func @transform_2(%arg0: i32) -> (i32, i32) {
    %c0_i32 = arith.constant 0 : i32
    %c0_i32_0 = arith.constant 0 : i32
    %c0_i32_1 = arith.constant 0 : i32
    return %c0_i32, %c0_i32_0 : i32, i32
  }
  func.func @transform_3(%arg0: i32) -> (i32, i32) {
    %c0_i32 = arith.constant 0 : i32
    %c0_i32_0 = arith.constant 0 : i32
    return %arg0, %c0_i32 : i32, i32
  }
  func.func @transform_4(%arg0: i32) -> (i32, i32) {
    %c0_i32 = arith.constant 0 : i32
    %c0_i32_0 = arith.constant 0 : i32
    return %arg0, %c0_i32 : i32, i32
  }
  func.func @transform_5(%arg0: i32) -> (i32, i32) {
    %c0_i32 = arith.constant 0 : i32
    %c0_i32_0 = arith.constant 0 : i32
    return %arg0, %c0_i32 : i32, i32
  }
  func.func @transform_6(%arg0: i32) -> (i32, i32) {
    %c0_i32 = arith.constant 0 : i32
    %c0_i32_0 = arith.constant 0 : i32
    return %arg0, %c0_i32 : i32, i32
  }
  func.func @transform_7(%arg0: i32) -> (i32, i32) {
    %c0_i32 = arith.constant 0 : i32
    %c0_i32_0 = arith.constant 0 : i32
    return %arg0, %c0_i32 : i32, i32
  }
}

</mosaic_0001>

<bundles_post_ra>
// kernel: tpu_custom_call.1
= control target key start
LH: loop header
LB: loop body
LE: loop exit
PB: predicated region body
PF: predicated region fallthrough
CT: control target
= control target key end

     0   :  { %s1627_s24 = smov 0   ;;  %s2647_s0 = inlined_call_operand.vmem [shape: f32[768,196], index: 0, kind: input, shape index: {}]   ;;  %s2648_s1 = inlined_call_operand.vmem [shape: f32[128,768], index: 1, kind: input, shape index: {}]   ;;  %s2649_s2 = inlined_call_operand.vmem [shape: f32[1,768], index: 2, kind: input, shape index: {}]   ;;  %s2650_s3 = inlined_call_operand.vmem [shape: f32[128,1], index: 3, kind: input, shape index: {}]   ;;  %s2651_s4 = inlined_call_operand.vmem [shape: f32[128,1], index: 4, kind: input, shape index: {}]   ;;  %s2652_s5 = inlined_call_operand.vmem [shape: f32[128,196], index: 5, kind: output, shape index: {0}]   ;;  %s2653_s6 = inlined_call_operand.vmem [shape: f32[128,1], index: 6, kind: output, shape index: {1}]   ;;  %s2654_s7 = inlined_call_operand.vmem [shape: f32[128,1], index: 7, kind: output, shape index: {2}]  }
   0x1 LB: > { %s1465_s25 = sadd.s32 4294967295, %s1584_s24   ;;  %p1469_p0 = scmp.ge.s32.totalorder %s1584_s24, 1  ;;  %s1584_s24 = sphi %s1627_s24, %s18_s24  }
   0x2   : > { %p266_p1 = scmp.lt.s32.totalorder %s1584_s24, 3 }
   0x4   : > { %p267_p2 = pnand %p1469_p0, %p266_p1 }
   0x5   : > { %v511_v0 = vld [vmem:[%s2647_s0 + $0x8] sm:$0xff] (!%p267_p2)  ;;  %v513_v1 = vld [vmem:[%s2647_s0 + $0x18] sm:$0xff] (!%p267_p2)  ;;  %v510_v5 = vld [vmem:[%s2647_s0] sm:$0xff] (!%p267_p2)  ;;  %s1817_s18 = sshll.u32 (!%p267_p2), %s1465_s25, 3  ;;  %vm1017_vm0 = vcmask (!%p267_p2), 556032   ;;  %vm1298_vm1 = vcmask (!%p267_p2), 7168  }
   0x6   : > { %270 = sbr.rel (%p267_p2) target bundleno = 829 (0x33d), region = 40  ;;  %v575_v2 = vld [vmem:[%s2647_s0 + $0x208] sm:$0xff] (!%p267_p2)  ;;  %v703_v3 = vpack.c.bf16 (!%p267_p2), %v513_v1, %v511_v0  ;;  %v577_v4 = vld [vmem:[%s2647_s0 + $0x218] sm:$0xff] (!%p267_p2)  ;;  %v512_v6 = vld [vmem:[%s2647_s0 + $0x10] sm:$0xff] (!%p267_p2)  ;;  %p321_p3 = scmp.lt.s32.totalorder (!%p267_p2), %s1817_s18, 15 }
   0x7   : > { %v735_v7 = vpack.c.bf16 (!%p267_p2), %v577_v4, %v575_v2  ;;  %v702_v8 = vpack.c.bf16 (!%p267_p2), %v512_v6, %v510_v5  ;;  %v574_v9 = vld [vmem:[%s2647_s0 + $0x200] sm:$0xff] (!%p267_p2)  ;;  %v576_v10 = vld [vmem:[%s2647_s0 + $0x210] sm:$0xff] (!%p267_p2)  ;;  %v515_v11 = vld [vmem:[%s2647_s0 + $0x28] sm:$0xff] (!%p267_p2) }
   0x8   : > { %798 = vmatprep.subr.bf16.mxu1 (!%p267_p2), %v703_v3  ;;  %v734_v12 = vpack.c.bf16 (!%p267_p2), %v576_v10, %v574_v9  ;;  %v517_v13 = vld [vmem:[%s2647_s0 + $0x38] sm:$0xff] (!%p267_p2)  ;;  %v579_v14 = vld [vmem:[%s2647_s0 + $0x228] sm:$0xff] (!%p267_p2)  ;;  %v514_v18 = vld [vmem:[%s2647_s0 + $0x20] sm:$0xff] (!%p267_p2) }
   0x9   : > { %v581_v15 = vld [vmem:[%s2647_s0 + $0x238] sm:$0xff] (!%p267_p2)  ;;  %871 = vmatprep.subr.bf16.mxu0 (!%p267_p2), %v735_v7  ;;  %799 = vmatpush1.bf16.msra.mxu1 (!%p267_p2), %v702_v8  ;;  %v705_v16 = vpack.c.bf16 (!%p267_p2), %v517_v13, %v515_v11  ;;  %v516_v19 = vld [vmem:[%s2647_s0 + $0x30] sm:$0xff] (!%p267_p2)  ;;  %v578_v20 = vld [vmem:[%s2647_s0 + $0x220] sm:$0xff] (!%p267_p2) }
   0xa   : > { %v737_v17 = vpack.c.bf16 (!%p267_p2), %v581_v15, %v579_v14  ;;  %872 = vmatpush1.bf16.msra.mxu0 (!%p267_p2), %v734_v12  ;;  %v704_v21 = vpack.c.bf16 (!%p267_p2), %v516_v19, %v514_v18  ;;  %v580_v22 = vld [vmem:[%s2647_s0 + $0x230] sm:$0xff] (!%p267_p2)  ;;  %v519_v23 = vld [vmem:[%s2647_s0 + $0x48] sm:$0xff] (!%p267_p2)  ;;  %v521_v24 = vld [vmem:[%s2647_s0 + $0x58] sm:$0xff] (!%p267_p2) }
   0xb   : > { %800 = vmatprep.subr.bf16.mxu1 (!%p267_p2), %v705_v16  ;;  %v736_v25 = vpack.c.bf16 (!%p267_p2), %v580_v22, %v578_v20  ;;  %v707_v26 = vpack.c.bf16 (!%p267_p2), %v521_v24, %v519_v23  ;;  %v583_v27 = vld [vmem:[%s2647_s0 + $0x248] sm:$0xff] (!%p267_p2)  ;;  %v585_v28 = vld [vmem:[%s2647_s0 + $0x258] sm:$0xff] (!%p267_p2)  ;;  %v518_v29 = vld [vmem:[%s2647_s0 + $0x40] sm:$0xff] (!%p267_p2) }
   0xc   : > { %873 = vmatprep.subr.bf16.mxu0 (!%p267_p2), %v737_v17  ;;  %v739_v30 = vpack.c.bf16 (!%p267_p2), %v585_v28, %v583_v27  ;;  %v520_v31 = vld [vmem:[%s2647_s0 + $0x50] sm:$0xff] (!%p267_p2)  ;;  %v582_v32 = vld [vmem:[%s2647_s0 + $0x240] sm:$0xff] (!%p267_p2)  ;;  %v523_v35 = vld [vmem:[%s2647_s0 + $0x68] sm:$0xff] (!%p267_p2) }
   0xd   : > { %v584_v33 = vld [vmem:[%s2647_s0 + $0x250] sm:$0xff]  ;;  %801 = vmatpush1.bf16.msra.mxu1 %v704_v21  ;;  %v706_v34 = vpack.c.bf16 %v520_v31, %v518_v29  ;;  %v525_v36 = vld [vmem:[%s2647_s0 + $0x78] sm:$0xff]  ;;  %v587_v37 = vld [vmem:[%s2647_s0 + $0x268] sm:$0xff]  ;;  %s2656_s18 = smov (!%p321_p3, %s1817_s18), 15 }
   0xe   : > { %874 = vmatpush1.bf16.msra.mxu0 %v736_v25  ;;  %802 = vmatprep.subr.bf16.mxu1 %v707_v26  ;;  %v738_v38 = vpack.c.bf16 %v584_v33, %v582_v32  ;;  %v709_v39 = vpack.c.bf16 %v525_v36, %v523_v35  ;;  %v589_v40 = vld [vmem:[%s2647_s0 + $0x278] sm:$0xff]  ;;  %v522_v41 = vld [vmem:[%s2647_s0 + $0x60] sm:$0xff]  ;;  %v524_v42 = vld [vmem:[%s2647_s0 + $0x70] sm:$0xff]  ;;  %s1550_s25 = smul.u32 48, %s2656_s18  ;;  %s1485_s16 = sshll.u32 %s2656_s18, 4 }
   0xf   : > { %875 = vmatprep.subr.bf16.mxu0 %v739_v30  ;;  %v741_v43 = vpack.c.bf16 %v589_v40, %v587_v37  ;;  %v586_v44 = vld [vmem:[%s2647_s0 + $0x260] sm:$0xff]  ;;  %v588_v45 = vld [vmem:[%s2647_s0 + $0x270] sm:$0xff]  ;;  %v527_v46 = vld [vmem:[%s2647_s0 + $0x88] sm:$0xff]  ;;  %v708_v50 = vpack.c.bf16 %v524_v42, %v522_v41  ;;  %s2604_s20 = scalar_lea.vmem %s2652_s5, %s1485_s16 }
  0x10   : > { %v529_v47 = vld [vmem:[%s2647_s0 + $0x98] sm:$0xff]  ;;  %v591_v48 = vld [vmem:[%s2647_s0 + $0x288] sm:$0xff]  ;;  %v740_v51 = vpack.c.bf16 %v588_v45, %v586_v44  ;;  %v526_v53 = vld [vmem:[%s2647_s0 + $0x80] sm:$0xff]  ;;  %s1927_s23 = scalar_lea.vmem %s2648_s1, %s1550_s25 }
  0x11   : > { %v593_v49 = vld [vmem:[%s2647_s0 + $0x298] sm:$0xff]  ;;  %803 = vmatpush1.bf16.msra.mxu1 %v706_v34  ;;  %v711_v52 = vpack.c.bf16 %v529_v47, %v527_v46  ;;  %v528_v54 = vld [vmem:[%s2647_s0 + $0x90] sm:$0xff]  ;;  %v590_v55 = vld [vmem:[%s2647_s0 + $0x280] sm:$0xff]  ;;  %v408_v47 = vlaneseq }
  0x12   : > { %876 = vmatpush1.bf16.msra.mxu0 %v738_v38  ;;  %804 = vmatprep.subr.bf16.mxu1 %v709_v39  ;;  %v743_v56 = vpack.c.bf16 %v593_v49, %v591_v48  ;;  %v592_v57 = vld [vmem:[%s2647_s0 + $0x290] sm:$0xff]  ;;  %v531_v58 = vld [vmem:[%s2647_s0 + $0xa8] sm:$0xff]  ;;  %v533_v59 = vld [vmem:[%s2647_s0 + $0xb8] sm:$0xff]  ;;  %v710_v62 = vpack.c.bf16 %v528_v54, %v526_v53 }
  0x13   : > { %877 = vmatprep.subr.bf16.mxu0 %v741_v43  ;;  %v595_v60 = vld [vmem:[%s2647_s0 + $0x2a8] sm:$0xff]  ;;  %v597_v61 = vld [vmem:[%s2647_s0 + $0x2b8] sm:$0xff]  ;;  %v742_v63 = vpack.c.bf16 %v592_v57, %v590_v55  ;;  %v713_v0 = vpack.c.bf16 %v533_v59, %v531_v58  ;;  %v530_v1 = vld [vmem:[%s2647_s0 + $0xa0] sm:$0xff] }
  0x14   : > { %v532_v2 = vld [vmem:[%s2647_s0 + $0xb0] sm:$0xff]  ;;  %v594_v3 = vld [vmem:[%s2647_s0 + $0x2a0] sm:$0xff]  ;;  %v745_v4 = vpack.c.bf16 %v597_v61, %v595_v60  ;;  %v535_v6 = vld [vmem:[%s2647_s0 + $0xc8] sm:$0xff]  ;;  %v1898_v60 = vshrl.u32 %v408_v47, 7 }
  0x15   : > { %805 = vmatpush1.bf16.msra.mxu1 %v708_v50  ;;  %v596_v5 = vld [vmem:[%s2647_s0 + $0x2b0] sm:$0xff]  ;;  %v537_v7 = vld [vmem:[%s2647_s0 + $0xd8] sm:$0xff]  ;;  %v599_v8 = vld [vmem:[%s2647_s0 + $0x2c8] sm:$0xff]  ;;  %v712_v10 = vpack.c.bf16 %v532_v2, %v530_v1 }
  0x16   : > { %878 = vmatpush1.bf16.msra.mxu0 %v740_v51  ;;  %806 = vmatprep.subr.bf16.mxu1 %v711_v52  ;;  %v601_v9 = vld [vmem:[%s2647_s0 + $0x2d8] sm:$0xff]  ;;  %v744_v11 = vpack.c.bf16 %v596_v5, %v594_v3  ;;  %v715_v12 = vpack.c.bf16 %v537_v7, %v535_v6  ;;  %v534_v13 = vld [vmem:[%s2647_s0 + $0xc0] sm:$0xff]  ;;  %v536_v14 = vld [vmem:[%s2647_s0 + $0xd0] sm:$0xff] }
  0x17   : > { %879 = vmatprep.subr.bf16.mxu0 %v743_v56  ;;  %v598_v15 = vld [vmem:[%s2647_s0 + $0x2c0] sm:$0xff]  ;;  %v747_v16 = vpack.c.bf16 %v601_v9, %v599_v8  ;;  %v600_v17 = vld [vmem:[%s2647_s0 + $0x2d0] sm:$0xff]  ;;  %v539_v18 = vld [vmem:[%s2647_s0 + $0xe8] sm:$0xff]  ;;  %v714_v22 = vpack.c.bf16 %v536_v14, %v534_v13  ;;  %v422_v13 = vsub.s32 3, %v1898_v60 }
  0x18   : > { %v541_v19 = vld [vmem:[%s2647_s0 + $0xf8] sm:$0xff]  ;;  %v603_v20 = vld [vmem:[%s2647_s0 + $0x2e8] sm:$0xff]  ;;  %v746_v23 = vpack.c.bf16 %v600_v17, %v598_v15  ;;  %v538_v25 = vld [vmem:[%s2647_s0 + $0xe0] sm:$0xff] }
  0x19   : > { %807 = vmatpush1.bf16.msra.mxu1 %v710_v62  ;;  %v605_v21 = vld [vmem:[%s2647_s0 + $0x2f8] sm:$0xff]  ;;  %v717_v24 = vpack.c.bf16 %v541_v19, %v539_v18  ;;  %v540_v26 = vld [vmem:[%s2647_s0 + $0xf0] sm:$0xff]  ;;  %v602_v27 = vld [vmem:[%s2647_s0 + $0x2e0] sm:$0xff]  ;;  %v426_v19 = vsub.s32 4, %v1898_v60 }
  0x1a   : > { %880 = vmatpush1.bf16.msra.mxu0 %v742_v63  ;;  %808 = vmatprep.subr.bf16.mxu1 %v713_v0  ;;  %v749_v28 = vpack.c.bf16 %v605_v21, %v603_v20  ;;  %v604_v29 = vld [vmem:[%s2647_s0 + $0x2f0] sm:$0xff]  ;;  %v543_v30 = vld [vmem:[%s2647_s0 + $0x108] sm:$0xff]  ;;  %v545_v31 = vld [vmem:[%s2647_s0 + $0x118] sm:$0xff]  ;;  %v716_v34 = vpack.c.bf16 %v540_v26, %v538_v25 }
  0x1b   : > { %881 = vmatprep.subr.bf16.mxu0 %v745_v4  ;;  %v607_v32 = vld [vmem:[%s2647_s0 + $0x308] sm:$0xff]  ;;  %v609_v33 = vld [vmem:[%s2647_s0 + $0x318] sm:$0xff]  ;;  %v748_v35 = vpack.c.bf16 %v604_v29, %v602_v27  ;;  %v719_v36 = vpack.c.bf16 %v545_v31, %v543_v30  ;;  %v542_v37 = vld [vmem:[%s2647_s0 + $0x100] sm:$0xff] }
  0x1c   : > { %v544_v38 = vld [vmem:[%s2647_s0 + $0x110] sm:$0xff]  ;;  %v606_v39 = vld [vmem:[%s2647_s0 + $0x300] sm:$0xff]  ;;  %v751_v40 = vpack.c.bf16 %v609_v33, %v607_v32  ;;  %v547_v42 = vld [vmem:[%s2647_s0 + $0x128] sm:$0xff] }
  0x1d   : > { %809 = vmatpush1.bf16.msra.mxu1 %v712_v10  ;;  %v608_v41 = vld [vmem:[%s2647_s0 + $0x310] sm:$0xff]  ;;  %v549_v43 = vld [vmem:[%s2647_s0 + $0x138] sm:$0xff]  ;;  %v611_v44 = vld [vmem:[%s2647_s0 + $0x328] sm:$0xff]  ;;  %v718_v46 = vpack.c.bf16 %v544_v38, %v542_v37 }
  0x1e   : > { %882 = vmatpush1.bf16.msra.mxu0 %v744_v11  ;;  %810 = vmatprep.subr.bf16.mxu1 %v715_v12  ;;  %v613_v45 = vld [vmem:[%s2647_s0 + $0x338] sm:$0xff]  ;;  %v750_v48 = vpack.c.bf16 %v608_v41, %v606_v39  ;;  %v721_v49 = vpack.c.bf16 %v549_v43, %v547_v42  ;;  %v546_v50 = vld [vmem:[%s2647_s0 + $0x120] sm:$0xff]  ;;  %v548_v51 = vld [vmem:[%s2647_s0 + $0x130] sm:$0xff]  ;;  %v414_v12 = vsub.s32 1, %v1898_v60 }
  0x1f   : > { %883 = vmatprep.subr.bf16.mxu0 %v747_v16  ;;  %v610_v52 = vld [vmem:[%s2647_s0 + $0x320] sm:$0xff]  ;;  %v753_v53 = vpack.c.bf16 %v613_v45, %v611_v44  ;;  %v612_v54 = vld [vmem:[%s2647_s0 + $0x330] sm:$0xff]  ;;  %v551_v55 = vld [vmem:[%s2647_s0 + $0x148] sm:$0xff]  ;;  %v720_v59 = vpack.c.bf16 %v548_v51, %v546_v50 }
  0x20   : > { %v553_v56 = vld [vmem:[%s2647_s0 + $0x158] sm:$0xff]  ;;  %v615_v57 = vld [vmem:[%s2647_s0 + $0x348] sm:$0xff]  ;;  %v752_v61 = vpack.c.bf16 %v612_v54, %v610_v52  ;;  %v550_v63 = vld [vmem:[%s2647_s0 + $0x140] sm:$0xff] }
  0x21   : > { %811 = vmatpush1.bf16.msra.mxu1 %v714_v22  ;;  %v617_v58 = vld [vmem:[%s2647_s0 + $0x358] sm:$0xff]  ;;  %v723_v62 = vpack.c.bf16 %v553_v56, %v551_v55  ;;  %v552_v0 = vld [vmem:[%s2647_s0 + $0x150] sm:$0xff]  ;;  %v614_v1 = vld [vmem:[%s2647_s0 + $0x340] sm:$0xff] }
  0x22   : > { %884 = vmatpush1.bf16.msra.mxu0 %v746_v23  ;;  %812 = vmatprep.subr.bf16.mxu1 %v717_v24  ;;  %v755_v2 = vpack.c.bf16 %v617_v58, %v615_v57  ;;  %v616_v3 = vld [vmem:[%s2647_s0 + $0x350] sm:$0xff]  ;;  %v555_v4 = vld [vmem:[%s2647_s0 + $0x168] sm:$0xff]  ;;  %v557_v5 = vld [vmem:[%s2647_s0 + $0x178] sm:$0xff]  ;;  %v722_v8 = vpack.c.bf16 %v552_v0, %v550_v63  ;;  %v418_v0 = vsub.s32 2, %v1898_v60 }
  0x23   : > { %885 = vmatprep.subr.bf16.mxu0 %v749_v28  ;;  %v619_v6 = vld [vmem:[%s2647_s0 + $0x368] sm:$0xff]  ;;  %v621_v7 = vld [vmem:[%s2647_s0 + $0x378] sm:$0xff]  ;;  %v554_v9 = vld [vmem:[%s2647_s0 + $0x160] sm:$0xff]  ;;  %v754_v14 = vpack.c.bf16 %v616_v3, %v614_v1  ;;  %v725_v15 = vpack.c.bf16 %v557_v5, %v555_v4 }
  0x24   : > { %v556_v10 = vld [vmem:[%s2647_s0 + $0x170] sm:$0xff]  ;;  %v618_v11 = vld [vmem:[%s2647_s0 + $0x360] sm:$0xff]  ;;  %v559_v17 = vld [vmem:[%s2647_s0 + $0x188] sm:$0xff]  ;;  %v757_v20 = vpack.c.bf16 %v621_v7, %v619_v6 }
  0x25   : > { %813 = vmatpush1.bf16.msra.mxu1 %v716_v34  ;;  %v620_v16 = vld [vmem:[%s2647_s0 + $0x370] sm:$0xff]  ;;  %v561_v18 = vld [vmem:[%s2647_s0 + $0x198] sm:$0xff]  ;;  %v623_v21 = vld [vmem:[%s2647_s0 + $0x388] sm:$0xff]  ;;  %v724_v27 = vpack.c.bf16 %v556_v10, %v554_v9 }
  0x26   : > { %886 = vmatpush1.bf16.msra.mxu0 %v748_v35  ;;  %814 = vmatprep.subr.bf16.mxu1 %v719_v36  ;;  %v625_v22 = vld [vmem:[%s2647_s0 + $0x398] sm:$0xff]  ;;  %v359_v23 = vld [vmem:[%s1927_s23 + $0x8] sm:$0xff]  ;;  %v1961_v25 = vld [vmem:[%s2649_s2] sm:$0x3f]  ;;  %v756_v28 = vpack.c.bf16 %v620_v16, %v618_v11  ;;  %v727_v32 = vpack.c.bf16 %v561_v18, %v559_v17 }
  0x27   : > { %887 = vmatprep.subr.bf16.mxu0 %v751_v40  ;;  %v365_v24 = vld [vmem:[%s1927_s23 + $0x38] sm:$0xff]  ;;  %v1965_v29 = vrot.slane %v1961_v25, %v414_v12  ;;  %v367_v30 = vld [vmem:[%s1927_s23 + $0x48] sm:$0xff]  ;;  %v1969_v31 = vrot.slane %v1961_v25, %v422_v13  ;;  %v759_v33 = vpack.c.bf16 %v625_v22, %v623_v21  ;;  %v558_v34 = vld [vmem:[%s2647_s0 + $0x180] sm:$0xff]  ;;  %v1981_v37 = vrot.slane %v1961_v25, %v426_v19 }
  0x28   : > { %v361_v26 = vld [vmem:[%s1927_s23 + $0x18] sm:$0xff]  ;;  %v560_v35 = vld [vmem:[%s2647_s0 + $0x190] sm:$0xff]  ;;  %v622_v36 = vld [vmem:[%s2647_s0 + $0x380] sm:$0xff]  ;;  %v2064_v18 = vrot.slane %v1961_v25, %v418_v0 }
  0x29   : > { %815 = vmatpush1.bf16.msra.mxu1 %v718_v46  ;;  %v624_v38 = vld [vmem:[%s2647_s0 + $0x390] sm:$0xff]  ;;  %v563_v39 = vld [vmem:[%s2647_s0 + $0x1a8] sm:$0xff]  ;;  %v565_v40 = vld [vmem:[%s2647_s0 + $0x1b8] sm:$0xff]  ;;  %v439_v41 = vmul.f32 %v1965_v29, %v359_v23  ;;  %v445_v42 = vmul.f32 %v1965_v29, %v365_v24  ;;  %v441_v43 = vmul.f32 %v1969_v31, %v361_v26  ;;  %v447_v44 = vmul.f32 %v1969_v31, %v367_v30 }
  0x2a   : > { %888 = vmatpush1.bf16.msra.mxu0 %v750_v48  ;;  %816 = vmatprep.subr.bf16.mxu1 %v721_v49  ;;  %v627_v45 = vld [vmem:[%s2647_s0 + $0x3a8] sm:$0xff]  ;;  %v629_v46 = vld [vmem:[%s2647_s0 + $0x3b8] sm:$0xff]  ;;  %v726_v47 = vpack.c.bf16 %v560_v35, %v558_v34  ;;  %v758_v50 = vpack.c.bf16 %v624_v38, %v622_v36  ;;  %v729_v51 = vpack.c.bf16 %v565_v40, %v563_v39  ;;  %v562_v52 = vld [vmem:[%s2647_s0 + $0x1a0] sm:$0xff] }
  0x2b   : > { %889 = vmatprep.subr.bf16.mxu0 %v753_v53  ;;  %v487_v48 = vpack.c.bf16 %v445_v42, %v439_v41  ;;  %v489_v49 = vpack.c.bf16 %v447_v44, %v441_v43  ;;  %v564_v53 = vld [vmem:[%s2647_s0 + $0x1b0] sm:$0xff]  ;;  %v626_v54 = vld [vmem:[%s2647_s0 + $0x3a0] sm:$0xff]  ;;  %v761_v55 = vpack.c.bf16 %v629_v46, %v627_v45  ;;  %v567_v57 = vld [vmem:[%s2647_s0 + $0x1c8] sm:$0xff] }
  0x2c   : > { %v628_v56 = vld [vmem:[%s2647_s0 + $0x3b0] sm:$0xff]  ;;  %v569_v58 = vld [vmem:[%s2647_s0 + $0x1d8] sm:$0xff]  ;;  %v728_v63 = vpack.c.bf16 %v564_v53, %v562_v52  ;;  %v566_v3 = vld [vmem:[%s2647_s0 + $0x1c0] sm:$0xff] }
  0x2d   : > { %817 = vmatpush1.bf16.msra.mxu1 %v720_v59  ;;  %830 = vmatprep.mubr.bf16.mxu1 %v487_v48  ;;  %v631_v59 = vld [vmem:[%s2647_s0 + $0x3c8] sm:$0xff]  ;;  %v760_v1 = vpack.c.bf16 %v628_v56, %v626_v54  ;;  %v568_v4 = vld [vmem:[%s2647_s0 + $0x1d0] sm:$0xff]  ;;  %v630_v5 = vld [vmem:[%s2647_s0 + $0x3c0] sm:$0xff] }
  0x2e   : > { %890 = vmatpush1.bf16.msra.mxu0 %v752_v61  ;;  %818 = vmatprep.subr.bf16.mxu1 %v723_v62  ;;  %v633_v61 = vld [vmem:[%s2647_s0 + $0x3d8] sm:$0xff]  ;;  %v410_v62 = vsub.s32 0, %v1898_v60  ;;  %v632_v7 = vld [vmem:[%s2647_s0 + $0x3d0] sm:$0xff]  ;;  %v635_v10 = vld [vmem:[%s2647_s0 + $0x3e8] sm:$0xff] }
  0x2f   : > { %891 = vmatprep.subr.bf16.mxu0 %v755_v2  ;;  %903 = vmatprep.mubr.bf16.mxu0 %v489_v49  ;;  %v731_v2 = vpack.c.bf16 %v569_v58, %v567_v57  ;;  %v763_v6 = vpack.c.bf16 %v633_v61, %v631_v59  ;;  %v573_v9 = vld [vmem:[%s2647_s0 + $0x1f8] sm:$0xff]  ;;  %v570_v12 = vld [vmem:[%s2647_s0 + $0x1e0] sm:$0xff]  ;;  %v364_v17 = vld [vmem:[%s1927_s23 + $0x30] sm:$0xff]  ;;  %v762_v19 = vpack.c.bf16 %v632_v7, %v630_v5 }
  0x30   : > { %v637_v11 = vld [vmem:[%s2647_s0 + $0x3f8] sm:$0xff]  ;;  %v2056_v13 = vrot.slane %v1961_v25, %v410_v62  ;;  %v358_v16 = vld [vmem:[%s1927_s23] sm:$0xff]  ;;  %v360_v22 = vld [vmem:[%s1927_s23 + $0x10] sm:$0xff] }
  0x31   : > { %819 = vmatpush1.bf16.msra.mxu1 %v722_v8  ;;  %v571_v8 = vld [vmem:[%s2647_s0 + $0x1e8] sm:$0xff]  ;;  %v634_v21 = vld [vmem:[%s2647_s0 + $0x3e0] sm:$0xff]  ;;  %v765_v24 = vpack.c.bf16 %v637_v11, %v635_v10  ;;  %v636_v26 = vld [vmem:[%s2647_s0 + $0x3f0] sm:$0xff]  ;;  %v440_v36 = vmul.f32 %v2064_v18, %v360_v22 }
  0x32   : > { %892 = vmatpush1.bf16.msra.mxu0 %v754_v14  ;;  %820 = vmatprep.subr.bf16.mxu1 %v725_v15  ;;  %v730_v14 = vpack.c.bf16 %v568_v4, %v566_v3  ;;  %v572_v15 = vld [vmem:[%s2647_s0 + $0x1f0] sm:$0xff]  ;;  %v366_v23 = vld [vmem:[%s1927_s23 + $0x40] sm:$0xff]  ;;  %v438_v30 = vmul.f32 %v2056_v13, %v358_v16  ;;  %v377_v34 = vld [vmem:[%s1927_s23 + $0x98] sm:$0xff]  ;;  %v764_v41 = vpack.c.bf16 %v636_v26, %v634_v21 }
  0x33   : > { %893 = vmatprep.subr.bf16.mxu0 %v757_v20  ;;  %v733_v20 = vpack.c.bf16 %v573_v9, %v571_v8  ;;  %v732_v35 = vpack.c.bf16 %v572_v15, %v570_v12  ;;  %v446_v38 = vmul.f32 %v2064_v18, %v366_v23  ;;  %v373_v39 = vld [vmem:[%s1927_s23 + $0x78] sm:$0xff]  ;;  %v379_v40 = vld [vmem:[%s1927_s23 + $0xa8] sm:$0xff]  ;;  %v638_v43 = vld [vmem:[%s2647_s0 + $0x400] sm:$0xff]  ;;  %v457_v48 = vmul.f32 %v1965_v29, %v377_v34 }
  0x34   : > { %v640_v44 = vld [vmem:[%s2647_s0 + $0x410] sm:$0xff]  ;;  %v643_v45 = vld [vmem:[%s2647_s0 + $0x428] sm:$0xff]  ;;  %v645_v46 = vld [vmem:[%s2647_s0 + $0x438] sm:$0xff] }
  0x35   : > { %821 = vmatpush1.bf16.msra.mxu1 %v724_v27  ;;  %v639_v27 = vld [vmem:[%s2647_s0 + $0x408] sm:$0xff]  ;;  %v488_v52 = vpack.c.bf16 %v446_v38, %v440_v36  ;;  %v766_v53 = vpack.c.bf16 %v640_v44, %v638_v43  ;;  %v642_v54 = vld [vmem:[%s2647_s0 + $0x420] sm:$0xff]  ;;  %v376_v56 = vld [vmem:[%s1927_s23 + $0x90] sm:$0xff]  ;;  %v769_v57 = vpack.c.bf16 %v645_v46, %v643_v45 }
  0x36   : > { %894 = vmatpush1.bf16.msra.mxu0 %v756_v28  ;;  %822 = vmatprep.subr.bf16.mxu1 %v727_v32  ;;  %v641_v28 = vld [vmem:[%s2647_s0 + $0x418] sm:$0xff]  ;;  %v444_v32 = vmul.f32 %v2056_v13, %v364_v17  ;;  %v644_v58 = vld [vmem:[%s2647_s0 + $0x430] sm:$0xff]  ;;  %v378_v61 = vld [vmem:[%s1927_s23 + $0xa0] sm:$0xff]  ;;  %v456_v3 = vmul.f32 %v2056_v13, %v376_v56 }
  0x37   : > { %895 = vmatprep.subr.bf16.mxu0 %v759_v33  ;;  %v371_v33 = vld [vmem:[%s1927_s23 + $0x68] sm:$0xff]  ;;  %v767_v42 = vpack.c.bf16 %v641_v28, %v639_v27  ;;  %v372_v59 = vld [vmem:[%s1927_s23 + $0x70] sm:$0xff]  ;;  %v389_v5 = vld [vmem:[%s1927_s23 + $0xf8] sm:$0xff]  ;;  %v458_v8 = vmul.f32 %v2064_v18, %v378_v61 }
  0x38   : > { %v486_v49 = vpack.c.bf16 %v444_v32, %v438_v30  ;;  %v647_v62 = vld [vmem:[%s2647_s0 + $0x448] sm:$0xff]  ;;  %v452_v7 = vmul.f32 %v2064_v18, %v372_v59  ;;  %v385_v9 = vld [vmem:[%s1927_s23 + $0xd8] sm:$0xff]  ;;  %v646_v12 = vld [vmem:[%s2647_s0 + $0x440] sm:$0xff] }
  0x39   : > { %823 = vmatpush1.bf16.msra.mxu1 %v726_v47  ;;  %v451_v47 = vmul.f32 %v1965_v29, %v371_v33  ;;  %v383_v4 = vld [vmem:[%s1927_s23 + $0xc8] sm:$0xff]  ;;  %v653_v16 = vld [vmem:[%s2647_s0 + $0x478] sm:$0xff]  ;;  %v652_v21 = vld [vmem:[%s2647_s0 + $0x470] sm:$0xff]  ;;  %v465_v23 = vmul.f32 %v1969_v31, %v385_v9 }
  0x3a   : > { %896 = vmatpush1.bf16.msra.mxu0 %v758_v50  ;;  %824 = vmatprep.subr.bf16.mxu1 %v729_v51  ;;  %v453_v50 = vmul.f32 %v1969_v31, %v373_v39  ;;  %v459_v51 = vmul.f32 %v1969_v31, %v379_v40  ;;  %v391_v10 = vld [vmem:[%s1927_s23 + $0x108] sm:$0xff]  ;;  %v463_v17 = vmul.f32 %v1965_v29, %v383_v4  ;;  %v382_v30 = vld [vmem:[%s1927_s23 + $0xc0] sm:$0xff]  ;;  %v388_v32 = vld [vmem:[%s1927_s23 + $0xf0] sm:$0xff] }
  0x3b   : > { %897 = vmatprep.subr.bf16.mxu0 %v761_v55  ;;  %v370_v55 = vld [vmem:[%s1927_s23 + $0x60] sm:$0xff]  ;;  %v493_v0 = vpack.c.bf16 %v457_v48, %v451_v47  ;;  %v651_v15 = vld [vmem:[%s2647_s0 + $0x468] sm:$0xff]  ;;  %v494_v28 = vpack.c.bf16 %v458_v8, %v452_v7  ;;  %v657_v34 = vld [vmem:[%s2647_s0 + $0x498] sm:$0xff]  ;;  %v462_v44 = vmul.f32 %v2056_v13, %v382_v30  ;;  %v468_v45 = vmul.f32 %v2056_v13, %v388_v32 }
  0x3c   : > { %v655_v27 = vld [vmem:[%s2647_s0 + $0x488] sm:$0xff]  ;;  %v773_v33 = vpack.c.bf16 %v653_v16, %v651_v15  ;;  %v390_v36 = vld [vmem:[%s1927_s23 + $0x100] sm:$0xff]  ;;  %v401_v46 = vld [vmem:[%s1927_s23 + $0x158] sm:$0xff] }
  0x3d   : > { %825 = vmatpush1.bf16.msra.mxu1 %v728_v63  ;;  %v649_v63 = vld [vmem:[%s2647_s0 + $0x458] sm:$0xff]  ;;  %v395_v39 = vld [vmem:[%s1927_s23 + $0x128] sm:$0xff]  ;;  %v775_v48 = vpack.c.bf16 %v657_v34, %v655_v27  ;;  %v392_v59 = vld [vmem:[%s1927_s23 + $0x110] sm:$0xff]  ;;  %v498_v4 = vpack.c.bf16 %v468_v45, %v462_v44 }
  0x3e   : > { %898 = vmatpush1.bf16.msra.mxu0 %v760_v1  ;;  %826 = vmatprep.subr.bf16.mxu1 %v731_v2  ;;  %v495_v1 = vpack.c.bf16 %v459_v51, %v453_v50  ;;  %v450_v2 = vmul.f32 %v2056_v13, %v370_v55  ;;  %v771_v11 = vpack.c.bf16 %v649_v63, %v647_v62  ;;  %v397_v47 = vld [vmem:[%s1927_s23 + $0x138] sm:$0xff]  ;;  %v403_v51 = vld [vmem:[%s1927_s23 + $0x168] sm:$0xff]  ;;  %v658_v62 = vld [vmem:[%s2647_s0 + $0x4a0] sm:$0xff] }
  0x3f   : > { %899 = vmatprep.subr.bf16.mxu0 %v763_v6  ;;  %v768_v6 = vpack.c.bf16 %v644_v58, %v642_v54  ;;  %v470_v50 = vmul.f32 %v2064_v18, %v390_v36  ;;  %v659_v54 = vld [vmem:[%s2647_s0 + $0x4a8] sm:$0xff]  ;;  %v2180_v55 = vmul.f32 %v1965_v29, %v395_v39  ;;  %v386_v58 = vld [vmem:[%s1927_s23 + $0xe0] sm:$0xff]  ;;  %v661_v61 = vld [vmem:[%s2647_s0 + $0x4b8] sm:$0xff] }
  0x40   : > { %v492_v22 = vpack.c.bf16 %v456_v3, %v450_v2  ;;  %v660_v63 = vld [vmem:[%s2647_s0 + $0x4b0] sm:$0xff]  ;;  %v2202_v2 = vmul.f32 %v1981_v37, %v386_v58  ;;  %v2205_v3 = vmul.f32 %v1981_v37, %v392_v59  ;;  %v374_v7 = vld [vmem:[%s1927_s23 + $0x80] sm:$0xff]  ;;  %v777_v16 = vpack.c.bf16 %v661_v61, %v659_v54  ;;  %v363_v34 = vld [vmem:[%s1927_s23 + $0x28] sm:$0xff] }
  0x41   : > { %827 = vmatpush1.bf16.msra.mxu1 %v730_v14  ;;  %v648_v14 = vld [vmem:[%s2647_s0 + $0x450] sm:$0xff]  ;;  %v398_v8 = vld [vmem:[%s1927_s23 + $0x140] sm:$0xff]  ;;  %v2219_v15 = vmul.f32 %v1981_v37, %v374_v7  ;;  %v387_v39 = vld [vmem:[%s1927_s23 + $0xe8] sm:$0xff] }
  0x42   : > { %900 = vmatpush1.bf16.msra.mxu0 %v762_v19  ;;  %828 = vmatprep.subr.bf16.mxu1 %v733_v20  ;;  %v469_v19 = vmul.f32 %v1965_v29, %v389_v5  ;;  %v650_v20 = vld [vmem:[%s2647_s0 + $0x460] sm:$0xff]  ;;  %v770_v26 = vpack.c.bf16 %v648_v14, %v646_v12  ;;  %v477_v5 = vmul.f32 %v1969_v31, %v397_v47  ;;  %v400_v12 = vld [vmem:[%s1927_s23 + $0x150] sm:$0xff]  ;;  %v671_v54 = vld [vmem:[%s2647_s0 + $0x508] sm:$0xff] }
  0x43   : > { %901 = vmatprep.subr.bf16.mxu0 %v765_v24  ;;  %v471_v24 = vmul.f32 %v1969_v31, %v391_v10  ;;  %v772_v40 = vpack.c.bf16 %v652_v21, %v650_v20  ;;  %v502_v14 = vpack.c.bf16 %v2205_v3, %v2202_v2  ;;  %v2228_v21 = vmul.f32 %v1981_v37, %v398_v8  ;;  %v674_v7 = vld [vmem:[%s2647_s0 + $0x520] sm:$0xff]  ;;  %v679_v8 = vld [vmem:[%s2647_s0 + $0x548] sm:$0xff] }
  0x44   : > { %v499_v38 = vpack.c.bf16 %v469_v19, %v463_v17  ;;  %v396_v17 = vld [vmem:[%s1927_s23 + $0x130] sm:$0xff]  ;;  %v402_v19 = vld [vmem:[%s1927_s23 + $0x160] sm:$0xff] }
  0x45   : > { %829 = vmatpush1.bf16.msra.mxu1 %v732_v35  ;;  %v384_v35 = vld [vmem:[%s1927_s23 + $0xd0] sm:$0xff]  ;;  %v501_v43 = vpack.c.bf16 %v471_v24, %v465_v23  ;;  %v663_v23 = vld [vmem:[%s2647_s0 + $0x4c8] sm:$0xff]  ;;  %v665_v24 = vld [vmem:[%s2647_s0 + $0x4d8] sm:$0xff] }
  0x46   : > { %902 = vmatpush1.bf16.msra.mxu0 %v764_v41  ;;  %1486 = vmatprep.subr.bf16.mxu1 %v767_v42  ;;  %v654_v41 = vld [vmem:[%s2647_s0 + $0x480] sm:$0xff] }
  0x47   : > { %944 = vmatprep.subr.bf16.mxu0 %v767_v42  ;;  %v656_v42 = vld [vmem:[%s2647_s0 + $0x490] sm:$0xff] }
  0x48   : > { %831 = vmatmul.mubr.bf16.vlgmr.msra.gmra.mrb[0].mxu1 %v486_v49  ;;  %v464_v49 = vmul.f32 %v2064_v18, %v384_v35  ;;  %v774_v9 = vpack.c.bf16 %v656_v42, %v654_v41  ;;  %v369_v35 = vld [vmem:[%s1927_s23 + $0x58] sm:$0xff]  ;;  %v779_v41 = vpack.c.bf16 %v665_v24, %v663_v23  ;;  %v664_v42 = vld [vmem:[%s2647_s0 + $0x4d0] sm:$0xff]  ;;  %v682_v23 = vld [vmem:[%s2647_s0 + $0x560] sm:$0xff] }
  0x49   : > { %904 = vmatmul.mubr.bf16.vlgmr.msra.gmra.mrb[0].mxu0 %v488_v52  ;;  %1502 = vmatpush1.bf16.msra.mxu1 %v766_v53  ;;  %v362_v52 = vld [vmem:[%s1927_s23 + $0x20] sm:$0xff]  ;;  %v684_v24 = vld [vmem:[%s2647_s0 + $0x570] sm:$0xff] }
  0x4a   : > { %945 = vmatpush1.bf16.msra.mxu0 %v766_v53  ;;  %1487 = vmatprep.subr.bf16.mxu1 %v769_v57  ;;  %v368_v53 = vld [vmem:[%s1927_s23 + $0x50] sm:$0xff]  ;;  %v2183_v56 = vmul.f32 %v1981_v37, %v362_v52  ;;  %v500_v10 = vpack.c.bf16 %v470_v50, %v464_v49  ;;  %v666_v52 = vld [vmem:[%s2647_s0 + $0x4e0] sm:$0xff] }
  0x4b   : > { %946 = vmatprep.subr.bf16.mxu0 %v769_v57  ;;  %840 = vmatprep.mubr.bf16.mxu1 %v493_v0  ;;  %v2186_v57 = vmul.f32 %v1981_v37, %v368_v53  ;;  %v481_v0 = vmul.f32 %v1965_v29, %v401_v46  ;;  %v668_v53 = vld [vmem:[%s2647_s0 + $0x4f0] sm:$0xff] }
  0x4c   : > { %913 = vmatprep.mubr.bf16.mxu0 %v495_v1  ;;  %v430_v1 = vsub.s32 5, %v1898_v60  ;;  %v380_v60 = vld [vmem:[%s1927_s23 + $0xb0] sm:$0xff]  ;;  %v780_v61 = vpack.c.bf16 %v668_v53, %v666_v52  ;;  %v399_v53 = vld [vmem:[%s1927_s23 + $0x148] sm:$0xff] }
  0x4d   : > { %1503 = vmatpush1.bf16.msra.mxu1 %v768_v6  ;;  %v490_v29 = vpack.c.bf16 %v2186_v57, %v2183_v56  ;;  %v2225_v20 = vmul.f32 %v1981_v37, %v380_v60  ;;  %v676_v60 = vld [vmem:[%s2647_s0 + $0x530] sm:$0xff] }
  0x4e   : > { %947 = vmatpush1.bf16.msra.mxu0 %v768_v6  ;;  %1488 = vmatprep.subr.bf16.mxu1 %v771_v11  ;;  %v483_v6 = vmul.f32 %v1969_v31, %v403_v51  ;;  %v404_v31 = vld [vmem:[%s1927_s23 + $0x170] sm:$0xff]  ;;  %v2238_v27 = vrot.slane %v1961_v25, %v430_v1  ;;  %v482_v25 = vmul.f32 %v2064_v18, %v402_v19  ;;  %v675_v1 = vld [vmem:[%s2647_s0 + $0x528] sm:$0xff] }
  0x4f   : > { %948 = vmatprep.subr.bf16.mxu0 %v771_v11  ;;  %v394_v11 = vld [vmem:[%s1927_s23 + $0x120] sm:$0xff]  ;;  %v496_v36 = vpack.c.bf16 %v2225_v20, %v2219_v15  ;;  %v700_v52 = vld [vmem:[%s2647_s0 + $0x5f0] sm:$0xff] }
  0x50   : > { %841 = vmatmul.mubr.bf16.gmra.mrb[4].mxu1 %v492_v22  ;;  %v776_v22 = vpack.c.bf16 %v660_v63, %v658_v62  ;;  %v507_v30 = vpack.c.bf16 %v483_v6, %v477_v5  ;;  %v474_v32 = vmul.f32 %v2056_v13, %v394_v11  ;;  %v443_v44 = vmul.f32 %v2238_v27, %v363_v34  ;;  %v670_v63 = vld [vmem:[%s2647_s0 + $0x500] sm:$0xff] }
  0x51   : > { %1504 = vmatpush1.bf16.msra.mxu1 %v770_v26  ;;  %914 = vmatmul.mubr.bf16.gmra.mrb[4].mxu0 %v494_v28  ;;  %v2241_v28 = vmul.f32 %v1981_v37, %v404_v31  ;;  %v393_v37 = vld [vmem:[%s1927_s23 + $0x118] sm:$0xff]  ;;  %v449_v45 = vmul.f32 %v2238_v27, %v369_v35  ;;  %v467_v47 = vmul.f32 %v2238_v27, %v387_v39  ;;  %v680_v31 = vld [vmem:[%s2647_s0 + $0x550] sm:$0xff]  ;;  %v686_v34 = vld [vmem:[%s2647_s0 + $0x580] sm:$0xff] }
  0x52   : > { %949 = vmatpush1.bf16.msra.mxu0 %v770_v26  ;;  %1489 = vmatprep.subr.bf16.mxu1 %v773_v33  ;;  %v505_v26 = vpack.c.bf16 %v481_v0, %v2180_v55  ;;  %v673_v55 = vld [vmem:[%s2647_s0 + $0x518] sm:$0xff]  ;;  %v672_v0 = vld [vmem:[%s2647_s0 + $0x510] sm:$0xff] }
  0x53   : > { %950 = vmatprep.subr.bf16.mxu0 %v773_v33  ;;  %850 = vmatprep.mubr.bf16.mxu1 %v499_v38  ;;  %v480_v33 = vmul.f32 %v2056_v13, %v400_v12  ;;  %v476_v38 = vmul.f32 %v2064_v18, %v396_v17  ;;  %v662_v13 = vld [vmem:[%s2647_s0 + $0x4c0] sm:$0xff]  ;;  %v667_v18 = vld [vmem:[%s2647_s0 + $0x4e8] sm:$0xff]  ;;  %v491_v58 = vpack.c.bf16 %v449_v45, %v443_v44  ;;  %v685_v17 = vld [vmem:[%s2647_s0 + $0x578] sm:$0xff] }
  0x54   : > { %923 = vmatprep.mubr.bf16.mxu0 %v501_v43  ;;  %v669_v43 = vld [vmem:[%s2647_s0 + $0x4f8] sm:$0xff]  ;;  %v778_v49 = vpack.c.bf16 %v664_v42, %v662_v13  ;;  %v783_v62 = vpack.c.bf16 %v673_v55, %v671_v54  ;;  %v782_v5 = vpack.c.bf16 %v672_v0, %v670_v63  ;;  %v678_v12 = vld [vmem:[%s2647_s0 + $0x540] sm:$0xff]  ;;  %v688_v35 = vld [vmem:[%s2647_s0 + $0x590] sm:$0xff] }
  0x55   : > { %1505 = vmatpush1.bf16.msra.mxu1 %v772_v40  ;;  %v504_v46 = vpack.c.bf16 %v480_v33, %v474_v32  ;;  %v506_v50 = vpack.c.bf16 %v482_v25, %v476_v38  ;;  %v781_v51 = vpack.c.bf16 %v669_v43, %v667_v18  ;;  %v786_v19 = vpack.c.bf16 %v680_v31, %v678_v12  ;;  %v691_v38 = vld [vmem:[%s2647_s0 + $0x5a8] sm:$0xff]  ;;  %v693_v25 = vld [vmem:[%s2647_s0 + $0x5b8] sm:$0xff]  ;;  %v692_v13 = vld [vmem:[%s2647_s0 + $0x5b0] sm:$0xff] }
  0x56   : > { %951 = vmatpush1.bf16.msra.mxu0 %v772_v40  ;;  %1490 = vmatprep.subr.bf16.mxu1 %v775_v48  ;;  %v508_v40 = vpack.c.bf16 %v2241_v28, %v2228_v21  ;;  %v788_v32 = vpack.c.bf16 %v684_v24, %v682_v23  ;;  %v790_v39 = vpack.c.bf16 %v688_v35, %v686_v34  ;;  %v695_v42 = vld [vmem:[%s2647_s0 + $0x5c8] sm:$0xff]  ;;  %v697_v18 = vld [vmem:[%s2647_s0 + $0x5d8] sm:$0xff]  ;;  %v694_v45 = vld [vmem:[%s2647_s0 + $0x5c0] sm:$0xff] }
  0x57   : > { %952 = vmatprep.subr.bf16.mxu0 %v775_v48  ;;  %v473_v48 = vmul.f32 %v2238_v27, %v393_v37  ;;  %v793_v37 = vpack.c.bf16 %v693_v25, %v691_v38  ;;  %v795_v44 = vpack.c.bf16 %v697_v18, %v695_v42  ;;  %v405_v54 = vld [vmem:[%s1927_s23 + $0x178] sm:$0xff]  ;;  %v375_v55 = vld [vmem:[%s1927_s23 + $0x88] sm:$0xff] }
  0x58   : > { %851 = vmatmul.mubr.bf16.gmra.mrb[8].mxu1 %v498_v4  ;;  %v677_v4 = vld [vmem:[%s2647_s0 + $0x538] sm:$0xff]  ;;  %v455_v63 = vmul.f32 %v2238_v27, %v375_v55 }
  0x59   : > { %1506 = vmatpush1.bf16.msra.mxu1 %v774_v9  ;;  %924 = vmatmul.mubr.bf16.gmra.mrb[8].mxu0 %v500_v10  ;;  %v503_v59 = vpack.c.bf16 %v473_v48, %v467_v47  ;;  %v785_v6 = vpack.c.bf16 %v677_v4, %v675_v1  ;;  %v784_v10 = vpack.c.bf16 %v676_v60, %v674_v7  ;;  %v699_v47 = vld [vmem:[%s2647_s0 + $0x5e8] sm:$0xff]  ;;  %v701_v48 = vld [vmem:[%s2647_s0 + $0x5f8] sm:$0xff] }
  0x5a   : > { %953 = vmatpush1.bf16.msra.mxu0 %v774_v9  ;;  %1491 = vmatprep.subr.bf16.mxu1 %v777_v16  ;;  %v681_v9 = vld [vmem:[%s2647_s0 + $0x558] sm:$0xff] }
  0x5b   : > { %954 = vmatprep.subr.bf16.mxu0 %v777_v16  ;;  %860 = vmatprep.mubr.bf16.mxu1 %v505_v26  ;;  %v787_v11 = vpack.c.bf16 %v681_v9, %v679_v8  ;;  %v683_v16 = vld [vmem:[%s2647_s0 + $0x568] sm:$0xff] }
  0x5c   : > { %933 = vmatprep.mubr.bf16.mxu0 %v507_v30  ;;  %v687_v26 = vld [vmem:[%s2647_s0 + $0x588] sm:$0xff]  ;;  %v689_v30 = vld [vmem:[%s2647_s0 + $0x598] sm:$0xff] }
  0x5d   : > { %1507 = vmatpush1.bf16.msra.mxu1 %v776_v22  ;;  %v791_v33 = vpack.c.bf16 %v689_v30, %v687_v26 }
  0x5e   : > { %955 = vmatpush1.bf16.msra.mxu0 %v776_v22  ;;  %1492 = vmatprep.subr.bf16.mxu1 %v779_v41  ;;  %v789_v22 = vpack.c.bf16 %v685_v17, %v683_v16 }
  0x5f   : > { %956 = vmatprep.subr.bf16.mxu0 %v779_v41  ;;  %v690_v41 = vld [vmem:[%s2647_s0 + $0x5a0] sm:$0xff] }
  0x60   : > { %861 = vmatmul.mubr.bf16.gmra.mrb[12].mxu1 %v504_v46  ;;  %v792_v43 = vpack.c.bf16 %v692_v13, %v690_v41  ;;  %v696_v46 = vld [vmem:[%s2647_s0 + $0x5d0] sm:$0xff] }
  0x61   : > { %1508 = vmatpush1.bf16.msra.mxu1 %v778_v49  ;;  %934 = vmatmul.mubr.bf16.gmra.mrb[12].mxu0 %v506_v50  ;;  %v698_v50 = vld [vmem:[%s2647_s0 + $0x5e0] sm:$0xff] }
  0x62   : > { %957 = vmatpush1.bf16.msra.mxu0 %v778_v49  ;;  %1493 = vmatprep.subr.bf16.mxu1 %v781_v51  ;;  %v794_v49 = vpack.c.bf16 %v696_v46, %v694_v45 }
  0x63   : > { %958 = vmatprep.subr.bf16.mxu0 %v781_v51  ;;  %976 = vmatprep.mubr.bf16.mxu0 %v491_v58  ;;  %v797_v51 = vpack.c.bf16 %v701_v48, %v699_v47  ;;  %v381_v58 = vld [vmem:[%s1927_s23 + $0xb8] sm:$0xff]  ;;  %s2441_s23 = sshll.u32 %s2656_s18, 3 }
  0x64   : > { %996 = vmatprep.mubr.bf16.mxu1 %v503_v59  ;;  %v796_v59 = vpack.c.bf16 %v700_v52, %v698_v50  ;;  %v461_v0 = vmul.f32 %v2238_v27, %v381_v58  ;;  %s2447_s30 = scalar_lea.vmem %s2653_s6, %s2441_s23  ;;  %s2552_s9 = scalar_lea.vmem %s2651_s4, %s2441_s23 }
  0x65   : > { %1509 = vmatpush1.bf16.msra.mxu1 %v780_v61  ;;  %s2564_s12 = scalar_lea.vmem %s2654_s7, %s2441_s23  ;;  %s2574_s15 = scalar_lea.vmem %s2650_s3, %s2441_s23 }
  0x66   : > { %959 = vmatpush1.bf16.msra.mxu0 %v780_v61  ;;  %1494 = vmatprep.subr.bf16.mxu1 %v783_v62  ;;  %v479_v61 = vmul.f32 %v2238_v27, %v399_v53  ;;  %v497_v4 = vpack.c.bf16 %v461_v0, %v455_v63 }
  0x67   : > { %960 = vmatprep.subr.bf16.mxu0 %v783_v62  ;;  %v485_v62 = vmul.f32 %v2238_v27, %v405_v54 }
  0x69   : > { %1510 = vmatpush1.bf16.msra.mxu1 %v782_v5  ;;  %v509_v1 = vpack.c.bf16 %v485_v62, %v479_v61 }
  0x6a   : > { %961 = vmatpush1.bf16.msra.mxu0 %v782_v5  ;;  %1495 = vmatprep.subr.bf16.mxu1 %v785_v6 }
  0x6b   : > { %962 = vmatprep.subr.bf16.mxu0 %v785_v6 }
  0x6d   : > { %1511 = vmatpush1.bf16.msra.mxu1 %v784_v10 }
  0x6e   : > { %963 = vmatpush1.bf16.msra.mxu0 %v784_v10  ;;  %1496 = vmatprep.subr.bf16.mxu1 %v787_v11 }
  0x6f   : > { %964 = vmatprep.subr.bf16.mxu0 %v787_v11 }
  0x71   : > { %1512 = vmatpush1.bf16.msra.mxu1 %v786_v19 }
  0x72   : > { %965 = vmatpush1.bf16.msra.mxu0 %v786_v19  ;;  %1497 = vmatprep.subr.bf16.mxu1 %v789_v22 }
  0x73   : > { %966 = vmatprep.subr.bf16.mxu0 %v789_v22 }
  0x75   : > { %1513 = vmatpush1.bf16.msra.mxu1 %v788_v32 }
  0x76   : > { %967 = vmatpush1.bf16.msra.mxu0 %v788_v32  ;;  %1498 = vmatprep.subr.bf16.mxu1 %v791_v33 }
  0x77   : > { %968 = vmatprep.subr.bf16.mxu0 %v791_v33 }
  0x79   : > { %1514 = vmatpush1.bf16.msra.mxu1 %v790_v39 }
  0x7a   : > { %969 = vmatpush1.bf16.msra.mxu0 %v790_v39  ;;  %1499 = vmatprep.subr.bf16.mxu1 %v793_v37 }
  0x7b   : > { %970 = vmatprep.subr.bf16.mxu0 %v793_v37 }
  0x7d   : > { %1515 = vmatpush1.bf16.msra.mxu1 %v792_v43 }
  0x7e   : > { %971 = vmatpush1.bf16.msra.mxu0 %v792_v43  ;;  %1500 = vmatprep.subr.bf16.mxu1 %v795_v44 }
  0x7f   : > { %972 = vmatprep.subr.bf16.mxu0 %v795_v44 }
  0x81   : > { %1516 = vmatpush1.bf16.msra.mxu1 %v794_v49 }
  0x82   : > { %973 = vmatpush1.bf16.msra.mxu0 %v794_v49  ;;  %1501 = vmatprep.subr.bf16.mxu1 %v797_v51 }
  0x83   : > { %974 = vmatprep.subr.bf16.mxu0 %v797_v51 }
  0x85   : > { %1517 = vmatpush1.bf16.msra.mxu1 %v796_v59 }
  0x86   : > { %975 = vmatpush1.bf16.msra.mxu0 %v796_v59 }
  0x88   : > { %997 = vmatmul.mubr.bf16.vlgmr.msra.gmra.mrb[16].mxu1 %v502_v14 }
  0x89   : > { %977 = vmatmul.mubr.bf16.vlgmr.msra.gmra.mrb[0].mxu0 %v490_v29  ;;  %1006 = vmatprep.mubr.bf16.mxu1 %v509_v1 }
  0x8a   : > { %986 = vmatprep.mubr.bf16.mxu0 %v497_v4 }
  0x90   : > { %1007 = vmatmul.mubr.bf16.gmra.mrb[20].mxu1 %v508_v40 }
  0x91   : > { %987 = vmatmul.mubr.bf16.gmra.mrb[4].mxu0 %v496_v36 }
 0x11b   : > { %v832_v27 = vpop.f32.mrb[0].mxu1 }
 0x11c   : > { %v834_v5 = vpop.f32.mrb[1].mxu1 }
 0x11d   : > { %v836_v6 = vpop.f32.mrb[2].mxu1 }
 0x11e   : > { %v838_v7 = vpop.f32.mrb[3].mxu1 }
 0x123   : > { %v842_v2 = vpop.f32.mrb[4].mxu1 }
 0x124   : > { %v844_v3 = vpop.f32.mrb[5].mxu1 }
 0x125   : > { %v2393_v14 = vpop.f32.mrb[6].mxu1 }
 0x126   : > { %v2395_v56 = vpop.f32.mrb[7].mxu1 }
 0x12b   : > { %v852_v57 = vpop.f32.mrb[8].mxu1 }
 0x12c   : > { %v925_v29 = vpop.f32.mrb[8].mxu0  ;;  %v854_v60 = vpop.f32.mrb[9].mxu1 }
 0x12d   : > { %v926_v8 = vadd.f32 %v925_v29, %v852_v57  ;;  %v927_v21 = vpop.f32.mrb[9].mxu0  ;;  %v856_v28 = vpop.f32.mrb[10].mxu1 }
 0x12e   : > { %v928_v40 = vadd.f32 %v927_v21, %v854_v60  ;;  %v929_v9 = vpop.f32.mrb[10].mxu0  ;;  %v858_v15 = vpop.f32.mrb[11].mxu1 }
 0x12f   : > { %v930_v20 = vadd.f32 %v929_v9, %v856_v28  ;;  %v931_v36 = vpop.f32.mrb[11].mxu0 }
 0x130   : > { %v932_v10 = vadd.f32 %v931_v36, %v858_v15 }
 0x133   : > { %v862_v11 = vpop.f32.mrb[12].mxu1 }
 0x134   : > { %v935_v12 = vpop.f32.mrb[12].mxu0  ;;  %v864_v31 = vpop.f32.mrb[13].mxu1 }
 0x135   : > { %v936_v16 = vadd.f32 %v935_v12, %v862_v11  ;;  %v937_v17 = vpop.f32.mrb[13].mxu0  ;;  %v866_v19 = vpop.f32.mrb[14].mxu1 }
 0x136   : > { %v938_v22 = vadd.f32 %v937_v17, %v864_v31  ;;  %v939_v23 = vpop.f32.mrb[14].mxu0  ;;  %v868_v24 = vpop.f32.mrb[15].mxu1 }
 0x137   : > { %v940_v26 = vadd.f32 %v939_v23, %v866_v19  ;;  %v941_v30 = vpop.f32.mrb[15].mxu0 }
 0x138   : > { %v942_v32 = vadd.f32 %v941_v30, %v868_v24 }
 0x15b   : > { %v998_v33 = vpop.f32.mrb[16].mxu1 }
 0x15c   : > { %v978_v34 = vpop.f32.mrb[0].mxu0  ;;  %v2397_v35 = vadd.f32 %v998_v33, %v926_v8  ;;  %v1000_v38 = vpop.f32.mrb[17].mxu1 }
 0x15d   : > { %v1518_v25 = vadd.f32 %v978_v34, %v832_v27  ;;  %v980_v39 = vpop.f32.mrb[1].mxu0  ;;  %v2399_v37 = vadd.f32 %v1000_v38, %v928_v40  ;;  %v1002_v41 = vpop.f32.mrb[18].mxu1 }
 0x15e   : > { %v1519_v13 = vadd.f32 %v980_v39, %v834_v5  ;;  %v982_v42 = vpop.f32.mrb[2].mxu0  ;;  %v2401_v18 = vadd.f32 %v1002_v41, %v930_v20  ;;  %v1004_v43 = vpop.f32.mrb[19].mxu1 }
 0x15f   : > { %v2403_v44 = vadd.f32 %v982_v42, %v836_v6  ;;  %v984_v45 = vpop.f32.mrb[3].mxu0  ;;  %v2405_v46 = vadd.f32 %v1004_v43, %v932_v10  ;;  %v1034_v52 = vsel %vm1017_vm0, %v2399_v37, 0.0 }
 0x160   : > { %v2407_v47 = vadd.f32 %v984_v45, %v838_v7  ;;  %v1018_v48 = vsel %vm1017_vm0, %v1519_v13, 0.0  ;;  %v1035_v0 = vadd.f32 %v1034_v52, %v2397_v35 }
 0x161   : > { %v1019_v49 = vadd.f32 %v1518_v25, %v1018_v48  ;;  %v1038_v50 = vsel %vm1017_vm0, %v2405_v46, 0.0 }
 0x162   : > { %v1039_v51 = vadd.f32 %v1038_v50, %v2401_v18  ;;  %v1022_v6 = vsel %vm1017_vm0, %v2407_v47, 0.0 }
 0x163   : > { %1020 = vadd.xlane.f32.xlu0 %v1019_v49  ;;  %v1008_v53 = vpop.f32.mrb[20].mxu1  ;;  %v1023_v8 = vadd.f32 %v2403_v44, %v1022_v6 }
 0x164   : > { %v988_v54 = vpop.f32.mrb[4].mxu0  ;;  %v2415_v55 = vadd.f32 %v1008_v53, %v936_v16  ;;  %v1010_v58 = vpop.f32.mrb[21].mxu1  ;;  %1040 = vadd.xlane.f32.xlu1 %v1039_v51 }
 0x165   : > { %v1522_v59 = vadd.f32 %v988_v54, %v842_v2  ;;  %v990_v61 = vpop.f32.mrb[5].mxu0  ;;  %v2417_v62 = vadd.f32 %v1010_v58, %v938_v22  ;;  %v1012_v63 = vpop.f32.mrb[22].mxu1 }
 0x166   : > { %v1523_v1 = vadd.f32 %v990_v61, %v844_v3  ;;  %v992_v4 = vpop.f32.mrb[6].mxu0  ;;  %v2420_v27 = vadd.f32 %v1012_v63, %v940_v26  ;;  %v1014_v5 = vpop.f32.mrb[23].mxu1 }
 0x167   : > { %v2425_v7 = vadd.f32 %v992_v4, %v2393_v14  ;;  %v994_v57 = vpop.f32.mrb[7].mxu0  ;;  %v2427_v29 = vadd.f32 %v1014_v5, %v942_v32  ;;  %1036 = vadd.xlane.f32.xlu0 %v1035_v0  ;;  %v1042_v28 = vsel %vm1017_vm0, %v2417_v62, 0.0 }
 0x168   : > { %v1525_v2 = vadd.f32 %v994_v57, %v2395_v56  ;;  %v1026_v60 = vsel %vm1017_vm0, %v1523_v1, 0.0  ;;  %v1043_v40 = vadd.f32 %v1042_v28, %v2415_v55 }
 0x169   : > { %v1027_v3 = vadd.f32 %v1522_v59, %v1026_v60  ;;  %v1046_v9 = vsel %vm1017_vm0, %v2427_v29, 0.0 }
 0x16a   : > { %v1030_v21 = vsel %vm1017_vm0, %v1525_v2, 0.0  ;;  %v1047_v56 = vadd.f32 %v1046_v9, %v2420_v27 }
 0x16b   : > { %1028 = vadd.xlane.f32.xlu1 %v1027_v3  ;;  %1024 = vadd.xlane.f32.xlu0 %v1023_v8  ;;  %v1031_v14 = vadd.f32 %v2425_v7, %v1030_v21 }
 0x16f   : > { %1032 = vadd.xlane.f32.xlu1 %v1031_v14  ;;  %1044 = vadd.xlane.f32.xlu0 %v1043_v40 }
 0x173   : > { %1048 = vadd.xlane.f32.xlu1 %v1047_v56  ;;  %v1586_v56 = vmov 0  }
 0x174   : > { %1560 = vset.pattern.permute.xlu1 %v1586_v56  ;;  %1561 = vset.pattern.permute.xlu0 %v1586_v56 }
 0x1f0   : > { %v1021_v15 = vpop.xlane.xlu0 %1020 }
 0x1f1   : > { %v1050_v20 = vmul.f32 0.0051020407, %v1021_v15  ;;  %v1041_v36 = vpop.xlane.xlu1 %1040 }
 0x1f2   : > { %v1055_v10 = vmul.f32 0.0051020407, %v1041_v36  ;;  %v1218_v36 = vld [vmem:[%s2552_s9] sm:$0xff] }
 0x1f3   : > { %v2449_v11 = vsub.f32 %v1518_v25, %v1050_v20  ;;  %v2451_v12 = vsub.f32 %v1519_v13, %v1050_v20  ;;  %1299 = vst.msk [vmem:[%s2447_s30] sm:$0xff] %vm1298_vm1, %v1050_v20  ;;  %v1219_v20 = vld [vmem:[%s2552_s9 + $0x8] sm:$0xff] }
 0x1f4   : > { %1304 = vst.msk [vmem:[%s2447_s30 + $0x28] sm:$0xff] %vm1298_vm1, %v1055_v10  ;;  %v1037_v31 = vpop.xlane.xlu0 %1036  ;;  %v2475_v25 = vsub.f32 %v2405_v46, %v1055_v10  ;;  %v2492_v42 = vsub.f32 %v2401_v18, %v1055_v10  ;;  %v1221_v10 = vld [vmem:[%s2552_s9 + $0x18] sm:$0xff] }
 0x1f5   : > { %v1054_v16 = vmul.f32 0.0051020407, %v1037_v31  ;;  %v1074_v17 = vmul.f32 %v2449_v11, %v2449_v11  ;;  %v1075_v19 = vmul.f32 %v2451_v12, %v2451_v12  ;;  %v1220_v31 = vld [vmem:[%s2552_s9 + $0x10] sm:$0xff] }
 0x1f6   : > { %v1085_v52 = vmul.f32 %v2475_v25, %v2475_v25 }
 0x1f7   : > { %v2462_v22 = vsub.f32 %v2397_v35, %v1054_v16  ;;  %v2465_v23 = vsub.f32 %v2399_v37, %v1054_v16  ;;  %1303 = vst.msk [vmem:[%s2447_s30 + $0x20] sm:$0xff] %vm1298_vm1, %v1054_v16  ;;  %v1090_v24 = vsel %vm1017_vm0, %v1075_v19, 0.0  ;;  %v1223_v16 = vld [vmem:[%s2552_s9 + $0x28] sm:$0xff] }
 0x1f8   : > { %v1029_v26 = vpop.xlane.xlu1 %1028  ;;  %v1025_v30 = vpop.xlane.xlu0 %1024  ;;  %v1091_v32 = vadd.f32 %v1090_v24, %v1074_v17  ;;  %v1222_v17 = vld [vmem:[%s2552_s9 + $0x20] sm:$0xff] }
 0x1f9   : > { %v1052_v33 = vmul.f32 0.0051020407, %v1029_v26  ;;  %v1051_v34 = vmul.f32 0.0051020407, %v1025_v30  ;;  %v1082_v38 = vmul.f32 %v2462_v22, %v2462_v22  ;;  %v1083_v35 = vmul.f32 %v2465_v23, %v2465_v23 }
 0x1fa   : > { %1092 = vadd.xlane.f32.xlu0 %v1091_v32 }
 0x1fb   : > { %v2477_v39 = vsub.f32 %v1522_v59, %v1052_v33  ;;  %v2479_v37 = vsub.f32 %v1523_v1, %v1052_v33  ;;  %1301 = vst.msk [vmem:[%s2447_s30 + $0x10] sm:$0xff] %vm1298_vm1, %v1052_v33  ;;  %v2484_v41 = vsub.f32 %v2403_v44, %v1051_v34  ;;  %v2487_v13 = vsub.f32 %v2407_v47, %v1051_v34 }
 0x1fc   : > { %1300 = vst.msk [vmem:[%s2447_s30 + $0x8] sm:$0xff] %vm1298_vm1, %v1051_v34  ;;  %v1033_v43 = vpop.xlane.xlu1 %1032  ;;  %v1045_v45 = vpop.xlane.xlu0 %1044  ;;  %v1106_v46 = vsel %vm1017_vm0, %v1083_v35, 0.0  ;;  %v1084_v1 = vmul.f32 %v2492_v42, %v2492_v42 }
 0x1fd   : > { %v1053_v48 = vmul.f32 0.0051020407, %v1033_v43  ;;  %v1056_v49 = vmul.f32 0.0051020407, %v1045_v45  ;;  %v1107_v50 = vadd.f32 %v1106_v46, %v1082_v38  ;;  %v1078_v44 = vmul.f32 %v2477_v39, %v2477_v39 }
 0x1fe   : > { %v1079_v47 = vmul.f32 %v2479_v37, %v2479_v37  ;;  %v1076_v51 = vmul.f32 %v2484_v41, %v2484_v41  ;;  %v1077_v18 = vmul.f32 %v2487_v13, %v2487_v13 }
 0x1ff   : > { %v2505_v53 = vsub.f32 %v1525_v2, %v1053_v48  ;;  %1302 = vst.msk [vmem:[%s2447_s30 + $0x18] sm:$0xff] %vm1298_vm1, %v1053_v48  ;;  %v2510_v54 = vsub.f32 %v2415_v55, %v1056_v49  ;;  %v2513_v58 = vsub.f32 %v2417_v62, %v1056_v49  ;;  %1305 = vst.msk [vmem:[%s2447_s30 + $0x30] sm:$0xff] %vm1298_vm1, %v1056_v49  ;;  %1108 = vadd.xlane.f32.xlu0 %v1107_v50  ;;  %v1130_v49 = vld [vmem:[%s2574_s15] sm:$0xff] }
 0x200   : > { %v2518_v59 = vsub.f32 %v2425_v7, %v1053_v48  ;;  %v1049_v61 = vpop.xlane.xlu1 %1048  ;;  %v1098_v63 = vsel %vm1017_vm0, %v1079_v47, 0.0  ;;  %v1094_v0 = vsel %vm1017_vm0, %v1077_v18, 0.0  ;;  %v1110_v7 = vsel %vm1017_vm0, %v1085_v52, 0.0 }
 0x201   : > { %v1057_v55 = vmul.f32 0.0051020407, %v1049_v61  ;;  %v1099_v4 = vadd.f32 %v1098_v63, %v1078_v44  ;;  %v1095_v5 = vadd.f32 %v1094_v0, %v1076_v51  ;;  %v1086_v62 = vmul.f32 %v2510_v54, %v2510_v54  ;;  %v1134_v0 = vld [vmem:[%s2574_s15 + $0x20] sm:$0xff] }
 0x202   : > { %v1087_v6 = vmul.f32 %v2513_v58, %v2513_v58  ;;  %v1081_v57 = vmul.f32 %v2505_v53, %v2505_v53  ;;  %v1111_v21 = vadd.f32 %v1110_v7, %v1084_v1  ;;  %v1080_v28 = vmul.f32 %v2518_v59, %v2518_v59  ;;  %v1225_v1 = vld [vmem:[%s2552_s9 + $0x38] sm:$0xff]  ;;  %v1131_v7 = vld [vmem:[%s2574_s15 + $0x8] sm:$0xff] }
 0x203   : > { %v2532_v2 = vsub.f32 %v2427_v29, %v1057_v55  ;;  %1306 = vst.msk [vmem:[%s2447_s30 + $0x38] sm:$0xff] %vm1298_vm1, %v1057_v55  ;;  %1100 = vadd.xlane.f32.xlu0 %v1099_v4  ;;  %1096 = vadd.xlane.f32.xlu1 %v1095_v5  ;;  %v2538_v3 = vsub.f32 %v2420_v27, %v1057_v55 }
 0x204   : > { %v1114_v60 = vsel %vm1017_vm0, %v1087_v6, 0.0  ;;  %v1102_v14 = vsel %vm1017_vm0, %v1081_v57, 0.0 }
 0x205   : > { %v1115_v8 = vadd.f32 %v1114_v60, %v1086_v62  ;;  %v1089_v29 = vmul.f32 %v2532_v2, %v2532_v2  ;;  %v1103_v40 = vadd.f32 %v1102_v14, %v1080_v28  ;;  %v1088_v9 = vmul.f32 %v2538_v3, %v2538_v3 }
 0x207   : > { %1116 = vadd.xlane.f32.xlu0 %v1115_v8  ;;  %1112 = vadd.xlane.f32.xlu1 %v1111_v21  ;;  %v1118_v27 = vsel %vm1017_vm0, %v1089_v29, 0.0  ;;  %v1135_v21 = vld [vmem:[%s2574_s15 + $0x28] sm:$0xff] }
 0x208   : > { %v1119_v15 = vadd.f32 %v1118_v27, %v1088_v9  ;;  %v1132_v9 = vld [vmem:[%s2574_s15 + $0x10] sm:$0xff] }
 0x20b   : > { %1104 = vadd.xlane.f32.xlu1 %v1103_v40 }
 0x20f   : > { %1120 = vadd.xlane.f32.xlu1 %v1119_v15  ;;  %v1136_v15 = vld [vmem:[%s2574_s15 + $0x30] sm:$0xff] }
 0x21d   : > { %1233 = vperm.xlu0 %1561, %v1219_v20  }
 0x220   : > { %1228 = vperm.xlu1 %1560, %v1218_v36  }
 0x221   : > { %1243 = vperm.xlu0 %1561, %v1221_v10   ;;  %v1133_v10 = vld [vmem:[%s2574_s15 + $0x18] sm:$0xff] }
 0x224   : > { %1238 = vperm.xlu1 %1560, %v1220_v31  }
 0x225   : > { %1253 = vperm.xlu0 %1561, %v1223_v16  }
 0x228   : > { %1248 = vperm.xlu1 %1560, %v1222_v17   ;;  %v1137_v17 = vld [vmem:[%s2574_s15 + $0x38] sm:$0xff] }
 0x287   : > { %v1093_v19 = vpop.xlane.xlu0 %1092 }
 0x288   : > { %v1122_v24 = vmul.f32 0.0051020407, %v1093_v19 }
 0x28a   : > { %v1138_v26 = vadd.f32 0.001, %v1122_v24  ;;  %1307 = vst.msk [vmem:[%s2564_s12] sm:$0xff] %vm1298_vm1, %v1122_v24  ;;  %v1224_v24 = vld [vmem:[%s2552_s9 + $0x30] sm:$0xff] }
 0x28c   : > { %1562 = vrsqrt.f32 %v1138_v26  ;;  %v1109_v30 = vpop.xlane.xlu0 %1108 }
 0x28d   : > { %v1126_v32 = vmul.f32 0.0051020407, %v1109_v30 }
 0x28f   : > { %v1142_v33 = vadd.f32 0.001, %v1126_v32  ;;  %1311 = vst.msk [vmem:[%s2564_s12 + $0x20] sm:$0xff] %vm1298_vm1, %v1126_v32 }
 0x290   : > { %v1101_v34 = vpop.xlane.xlu0 %1100  ;;  %v1097_v38 = vpop.xlane.xlu1 %1096 }
 0x291   : > { %1564 = vrsqrt.f32 %v1142_v33  ;;  %v1124_v35 = vmul.f32 0.0051020407, %v1101_v34  ;;  %v1123_v43 = vmul.f32 0.0051020407, %v1097_v38 }
 0x293   : > { %1309 = vst.msk [vmem:[%s2564_s12 + $0x10] sm:$0xff] %vm1298_vm1, %v1124_v35  ;;  %v1139_v45 = vadd.f32 0.001, %v1123_v43  ;;  %1308 = vst.msk [vmem:[%s2564_s12 + $0x8] sm:$0xff] %vm1298_vm1, %v1123_v43  ;;  %v1140_v52 = vadd.f32 0.001, %v1124_v35 }
 0x294   : > { %v1117_v46 = vpop.xlane.xlu0 %1116  ;;  %v1113_v48 = vpop.xlane.xlu1 %1112 }
 0x295   : > { %v1128_v50 = vmul.f32 0.0051020407, %v1117_v46  ;;  %v1127_v44 = vmul.f32 0.0051020407, %v1113_v48  ;;  %1566 = vrsqrt.f32 %v1139_v45 }
 0x296   : > { %v1563_v47 = vpop.eup %1562 }
 0x297   : > { %1313 = vst.msk [vmem:[%s2564_s12 + $0x30] sm:$0xff] %vm1298_vm1, %v1128_v50  ;;  %v1143_v51 = vadd.f32 0.001, %v1127_v44  ;;  %1312 = vst.msk [vmem:[%s2564_s12 + $0x28] sm:$0xff] %vm1298_vm1, %v1127_v44  ;;  %v1154_v18 = vmul.f32 %v1563_v47, %v1130_v49  ;;  %v1144_v4 = vadd.f32 0.001, %v1128_v50 }
 0x298   : > { %v1105_v61 = vpop.xlane.xlu1 %1104 }
 0x299   : > { %v1125_v63 = vmul.f32 0.0051020407, %v1105_v61  ;;  %1164 = vperm.xlu0 %1561, %v1154_v18   ;;  %1568 = vrsqrt.f32 %v1143_v51 }
 0x29a   : > { %1570 = vrsqrt.f32 %v1140_v52 }
 0x29b   : > { %v1565_v55 = vpop.eup %1564  ;;  %1310 = vst.msk [vmem:[%s2564_s12 + $0x18] sm:$0xff] %vm1298_vm1, %v1125_v63  ;;  %1572 = vrsqrt.f32 %v1144_v4  ;;  %v1141_v60 = vadd.f32 0.001, %v1125_v63 }
 0x29c   : > { %v1121_v5 = vpop.xlane.xlu1 %1120  ;;  %v1158_v62 = vmul.f32 %v1565_v55, %v1134_v0  ;;  %v1234_v26 = vpop.permute.xlu0 %1233 }
 0x29d   : > { %v1129_v6 = vmul.f32 0.0051020407, %v1121_v5  ;;  %1263 = vperm.xlu0 %1561, %v1225_v1   ;;  %1574 = vrsqrt.f32 %v1141_v60 }
 0x29e   : > { %1184 = vperm.xlu1 %1560, %v1158_v62  }
 0x29f   : > { %1314 = vst.msk [vmem:[%s2564_s12 + $0x38] sm:$0xff] %vm1298_vm1, %v1129_v6  ;;  %v1567_v57 = vpop.eup %1566  ;;  %v1145_v14 = vadd.f32 0.001, %v1129_v6 }
 0x2a0   : > { %v1155_v8 = vmul.f32 %v1567_v57, %v1131_v7  ;;  %v1244_v30 = vpop.permute.xlu0 %1243  ;;  %v1229_v32 = vpop.permute.xlu1 %1228 }
 0x2a1   : > { %1576 = vrsqrt.f32 %v1145_v14 }
 0x2a2   : > { %1169 = vperm.xlu1 %1560, %v1155_v8  }
 0x2a3   : > { %v1569_v28 = vpop.eup %1568 }
 0x2a4   : > { %v1159_v29 = vmul.f32 %v1569_v28, %v1135_v21  ;;  %v1571_v40 = vpop.eup %1570  ;;  %v1254_v33 = vpop.permute.xlu0 %1253 }
 0x2a5   : > { %v1156_v56 = vmul.f32 %v1571_v40, %v1132_v9  ;;  %v1573_v27 = vpop.eup %1572  ;;  %v1239_v34 = vpop.permute.xlu1 %1238 }
 0x2a6   : > { %1189 = vperm.xlu1 %1560, %v1159_v29   ;;  %v1160_v20 = vmul.f32 %v1573_v27, %v1136_v15 }
 0x2a7   : > { %v1575_v36 = vpop.eup %1574 }
 0x2a8   : > { %v1157_v31 = vmul.f32 %v1575_v36, %v1133_v10 }
 0x2a9   : > { %v1249_v35 = vpop.permute.xlu1 %1248 }
 0x2aa   : > { %1174 = vperm.xlu1 %1560, %v1156_v56  }
 0x2ab   : > { %v1577_v16 = vpop.eup %1576 }
 0x2ac   : > { %v1161_v19 = vmul.f32 %v1577_v16, %v1137_v17 }
 0x2ae   : > { %1194 = vperm.xlu1 %1560, %v1160_v20  }
 0x2b2   : > { %1179 = vperm.xlu1 %1560, %v1157_v31  }
 0x2b6   : > { %1199 = vperm.xlu1 %1560, %v1161_v19  }
 0x2ba   : > { %1258 = vperm.xlu1 %1560, %v1224_v24  }
 0x318   : > { %v1165_v38 = vpop.permute.xlu0 %1164 }
 0x319   : > { %v1202_v43 = vmul.f32 %v1165_v38, %v2449_v11  ;;  %v1203_v45 = vmul.f32 %v1165_v38, %v2451_v12 }
 0x31b   : > { %v1266_v46 = vadd.f32 %v1229_v32, %v1202_v43  ;;  %v1267_v48 = vadd.f32 %v1229_v32, %v1203_v45 }
 0x31c   : > { %v1264_v8 = vpop.permute.xlu0 %1263 }
 0x31d   : > { %1282 = vst [vmem:[%s2604_s20] sm:$0xff] %v1266_v46  ;;  %1283 = vst.msk [vmem:[%s2604_s20 + $0x8] sm:$0xff] %vm1017_vm0, %v1267_v48  ;;  %v1185_v49 = vpop.permute.xlu1 %1184 }
 0x31e   : > { %v1210_v11 = vmul.f32 %v1185_v49, %v2462_v22  ;;  %v1211_v12 = vmul.f32 %v1185_v49, %v2465_v23 }
 0x320   : > { %v1274_v50 = vadd.f32 %v1249_v35, %v1210_v11  ;;  %v1275_v44 = vadd.f32 %v1249_v35, %v1211_v12 }
 0x321   : > { %v1170_v47 = vpop.permute.xlu1 %1169 }
 0x322   : > { %1290 = vst [vmem:[%s2604_s20 + $0x40] sm:$0xff] %v1274_v50  ;;  %1291 = vst.msk [vmem:[%s2604_s20 + $0x48] sm:$0xff] %vm1017_vm0, %v1275_v44  ;;  %v1204_v51 = vmul.f32 %v1170_v47, %v2484_v41  ;;  %v1205_v18 = vmul.f32 %v1170_v47, %v2487_v13 }
 0x324   : > { %v1268_v52 = vadd.f32 %v1234_v26, %v1204_v51  ;;  %v1269_v61 = vadd.f32 %v1234_v26, %v1205_v18 }
 0x325   : > { %v1190_v63 = vpop.permute.xlu1 %1189 }
 0x326   : > { %1284 = vst [vmem:[%s2604_s20 + $0x10] sm:$0xff] %v1268_v52  ;;  %1285 = vst.msk [vmem:[%s2604_s20 + $0x18] sm:$0xff] %vm1017_vm0, %v1269_v61  ;;  %v1212_v22 = vmul.f32 %v1190_v63, %v2492_v42  ;;  %v1213_v23 = vmul.f32 %v1190_v63, %v2475_v25 }
 0x328   : > { %v1276_v0 = vadd.f32 %v1254_v33, %v1212_v22  ;;  %v1277_v1 = vadd.f32 %v1254_v33, %v1213_v23 }
 0x329   : > { %v1175_v55 = vpop.permute.xlu1 %1174 }
 0x32a   : > { %1292 = vst [vmem:[%s2604_s20 + $0x50] sm:$0xff] %v1276_v0  ;;  %1293 = vst.msk [vmem:[%s2604_s20 + $0x58] sm:$0xff] %vm1017_vm0, %v1277_v1  ;;  %v1206_v41 = vmul.f32 %v1175_v55, %v2477_v39  ;;  %v1207_v13 = vmul.f32 %v1175_v55, %v2479_v37 }
 0x32c   : > { %v1270_v4 = vadd.f32 %v1239_v34, %v1206_v41  ;;  %v1271_v5 = vadd.f32 %v1239_v34, %v1207_v13 }
 0x32d   : > { %v1195_v62 = vpop.permute.xlu1 %1194 }
 0x32e   : > { %1286 = vst [vmem:[%s2604_s20 + $0x20] sm:$0xff] %v1270_v4  ;;  %1287 = vst.msk [vmem:[%s2604_s20 + $0x28] sm:$0xff] %vm1017_vm0, %v1271_v5  ;;  %v1214_v21 = vmul.f32 %v1195_v62, %v2510_v54 }
 0x331   : > { %v1180_v42 = vpop.permute.xlu1 %1179 }
 0x332   : > { %v1208_v25 = vmul.f32 %v1180_v42, %v2518_v59  ;;  %v1209_v6 = vmul.f32 %v1180_v42, %v2505_v53  ;;  %v1215_v59 = vmul.f32 %v1195_v62, %v2513_v58 }
 0x334   : > { %v1272_v7 = vadd.f32 %v1244_v30, %v1208_v25  ;;  %v1273_v57 = vadd.f32 %v1244_v30, %v1209_v6 }
 0x335   : > { %v1200_v60 = vpop.permute.xlu1 %1199 }
 0x336   : > { %1288 = vst [vmem:[%s2604_s20 + $0x30] sm:$0xff] %v1272_v7  ;;  %1289 = vst.msk [vmem:[%s2604_s20 + $0x38] sm:$0xff] %vm1017_vm0, %v1273_v57  ;;  %v1216_v39 = vmul.f32 %v1200_v60, %v2538_v3  ;;  %v1217_v37 = vmul.f32 %v1200_v60, %v2532_v2 }
 0x338   : > { %v1280_v28 = vadd.f32 %v1264_v8, %v1216_v39  ;;  %v1281_v14 = vadd.f32 %v1264_v8, %v1217_v37 }
 0x339   : > { %v1259_v53 = vpop.permute.xlu1 %1258 }
 0x33a   : > { %1296 = vst [vmem:[%s2604_s20 + $0x70] sm:$0xff] %v1280_v28  ;;  %1297 = vst.msk [vmem:[%s2604_s20 + $0x78] sm:$0xff] %vm1017_vm0, %v1281_v14  ;;  %v1278_v29 = vadd.f32 %v1259_v53, %v1214_v21  ;;  %v1279_v40 = vadd.f32 %v1259_v53, %v1215_v59 }
 0x33c   : > { %1294 = vst [vmem:[%s2604_s20 + $0x60] sm:$0xff] %v1278_v29  ;;  %1295 = vst.msk [vmem:[%s2604_s20 + $0x68] sm:$0xff] %vm1017_vm0, %v1279_v40 }
 0x33d PF: > { %s18_s24 = sadd.s32 1, %s1584_s24  }
 0x33e   : > { %p15_p4 = scmp.ge.s32.totalorder %s18_s24, 4  }
 0x340   :  { %17 = sbr.rel (!%p15_p4) target bundleno = 1 (0x1), region = 100 }

</bundles_post_ra>
